<compile_context>
chip_gen: v5e
topology: v5e:2x2
jax: 0.10.0
libtpu: 0.0.40
codegen_flags: <defaults>
</compile_context>

<pallas_src>
import jax
import jax.numpy as jnp
from jax.experimental import pallas as pl
from jax.experimental.pallas import tpu as pltpu

EMB = 16                       # self._embedding_size
FEATURE_COUNT = 4              # lr_layer.feature_count (schema-derived; small demo value)
D = FEATURE_COUNT * EMB        # emb_output_size = 64
H1, H2 = 1024, 512
EPS = 1e-5
VOCAB = 128
IDS_PER_FEATURE = 3
TB_DEFAULT = 256               # batch tile: safe for v5e/v6e/v7x VMEM budgets


def _round_up(x, m):
    return (x + m - 1) // m * m


def embedding_sum_concat(ids, table):
    """ids: [B, F, M] int32, table: [VOCAB, EMB] -> [B, F*EMB] (plain JAX glue)."""
    emb = jnp.take(table, ids, axis=0)          # [B, F, M, EMB]
    summed = jnp.sum(emb, axis=2)               # [B, F, EMB]
    return summed.reshape(ids.shape[0], FEATURE_COUNT * EMB)


def _wdl_dense_kernel(wide_ref, deep_ref,
                      w1_ref, b1_ref, w2_ref, b2_ref, w3_ref, b3_ref,
                      out_ref):
    # Normalization is pre-folded into w1/b1, so the deep tower is just
    # two bf16 matmuls (f32 accumulate) + ReLU + a lane reduce.
    deep = deep_ref[...].astype(jnp.bfloat16)                          # [TB, D]

    # Linear(D, 1024) (+ folded Normalization) + ReLU
    h1 = jnp.dot(deep, w1_ref[...],
                 preferred_element_type=jnp.float32) + b1_ref[...]     # [TB, 1024]
    h1 = jnp.maximum(h1, 0.0).astype(jnp.bfloat16)

    # Linear(1024, 512) + ReLU
    h2 = jnp.dot(h1, w2_ref[...],
                 preferred_element_type=jnp.float32) + b2_ref[...]     # [TB, 512]
    h2 = jnp.maximum(h2, 0.0)

    # Linear(512, 1): w3 stored as [1, 512] -> VPU mul + XLU lane reduce
    # (XLU slot is idle here, so the reduce is free relative to the matmuls).
    d = jnp.sum(h2 * w3_ref[...], axis=-1, keepdims=True) + b3_ref[...]  # [TB, 1]

    # torch.add(wide, deep) broadcasts [TB,1] over [TB,D]; then Sigmoid.
    # NOTE: output lane width is 64 (<128) -> masked stores; kept because the
    # module semantics produce a [B, 64] output.
    out_ref[...] = jax.nn.sigmoid(wide_ref[...] + d)                   # [TB, D]


def wdl_dense(wide, deep, kparams, tb=TB_DEFAULT):
    """wide, deep: [B, D] f32; kparams: folded kernel params -> [B, D] f32."""
    B, Dm = wide.shape
    TB = min(tb, _round_up(B, 8))
    B_pad = _round_up(B, TB)
    if B_pad != B:
        pad = B_pad - B
        wide = jnp.pad(wide, ((0, pad), (0, 0)))
        deep = jnp.pad(deep, ((0, pad), (0, 0)))

    grid = (pl.cdiv(B_pad, TB),)

    tile_spec = pl.BlockSpec((TB, Dm), lambda i: (i, 0))
    const = lambda shape: pl.BlockSpec(shape, lambda i: (0, 0))

    args = (wide, deep,
            kparams["w1"], kparams["b1"],
            kparams["w2"], kparams["b2"],
            kparams["w3"], kparams["b3"])

    in_specs = [
        tile_spec,                 # wide  [TB, D]
        tile_spec,                 # deep  [TB, D]
        const((D, H1)),            # w1 (bf16, norm-folded), resident
        const((1, H1)),            # b1
        const((H1, H2)),           # w2 (bf16), resident
        const((1, H2)),            # b2
        const((1, H2)),            # w3
        const((1, 1)),             # b3
    ]

    flops = 2 * B_pad * (D * H1 + H1 * H2 + H2)
    bytes_accessed = (
        2 * B_pad * Dm * 4            # wide + deep reads
        + B_pad * Dm * 4              # output writes
        + D * H1 * 2 + H1 * H2 * 2    # bf16 weights
        + (H1 + H2 + H2 + 1) * 4      # biases + w3
    )

    return pl.pallas_call(
        _wdl_dense_kernel,
        out_shape=jax.ShapeDtypeStruct((B_pad, Dm), jnp.float32),
        grid=grid,
        in_specs=in_specs,
        out_specs=tile_spec,
        compiler_params=pltpu.CompilerParams(
            dimension_semantics=("parallel",)),
        cost_estimate=pl.CostEstimate(
            flops=flops,
            transcendentals=B_pad * Dm,
            bytes_accessed=bytes_accessed),
    )(*args)[:B]


def make_params(key):
    ks = jax.random.split(key, 10)
    return {
        # Normalization(D) (inference-style running stats + affine)
        "gamma": jnp.ones((1, D), jnp.float32),
        "beta": jnp.zeros((1, D), jnp.float32),
        "mean": jax.random.normal(ks[0], (1, D), jnp.float32) * 0.1,
        "var": jnp.ones((1, D), jnp.float32)
               + 0.1 * jax.random.uniform(ks[1], (1, D), jnp.float32),
        # Linear(D, 1024)
        "w1": jax.random.normal(ks[2], (D, H1), jnp.float32) * 0.02,
        "b1": jnp.zeros((1, H1), jnp.float32),
        # Linear(1024, 512)
        "w2": jax.random.normal(ks[3], (H1, H2), jnp.float32) * 0.02,
        "b2": jnp.zeros((1, H2), jnp.float32),
        # Linear(512, 1)  (stored as [1, 512])
        "w3": jax.random.normal(ks[4], (1, H2), jnp.float32) * 0.02,
        "b3": jnp.zeros((1, 1), jnp.float32),
        # Embedding tables (NormalTensorInitializer(var=0.01) -> std=0.1)
        "lr_table": jax.random.normal(ks[5], (VOCAB, EMB), jnp.float32) * 0.1,
        "deep_table": jax.random.normal(ks[6], (VOCAB, EMB), jnp.float32) * 0.1,
    }


def fold_params(p):
    """Fold Normalization into Linear1 and cast matmul weights to bf16."""
    scale = p["gamma"] / jnp.sqrt(p["var"] + EPS)            # [1, D]
    shift = p["beta"] - p["mean"] * scale                    # [1, D]
    w1f = scale.reshape(D, 1) * p["w1"]                      # [D, H1]
    b1f = p["b1"] + shift @ p["w1"]                          # [1, H1]
    return {
        "w1": w1f.astype(jnp.bfloat16),
        "b1": b1f.astype(jnp.float32),
        "w2": p["w2"].astype(jnp.bfloat16),
        "b2": p["b2"].astype(jnp.float32),
        "w3": p["w3"].astype(jnp.float32),
        "b3": p["b3"].astype(jnp.float32),
    }


def demo_module_forward(ids, params, kparams):
    x0 = embedding_sum_concat(ids, params["lr_table"])    # wide  [B, D]
    x1 = embedding_sum_concat(ids, params["deep_table"])  # deep  [B, D]
    return wdl_dense(x0, x1, kparams)                      # [B, D]


def reference_forward(ids, params):
    x0 = embedding_sum_concat(ids, params["lr_table"])
    x1 = embedding_sum_concat(ids, params["deep_table"])
    norm = (x1 - params["mean"]) / jnp.sqrt(params["var"] + EPS) \
           * params["gamma"] + params["beta"]
    h1 = jnp.maximum(norm @ params["w1"] + params["b1"], 0.0)
    h2 = jnp.maximum(h1 @ params["w2"] + params["b2"], 0.0)
    d = jnp.sum(h2 * params["w3"], axis=-1, keepdims=True) + params["b3"]
    return jax.nn.sigmoid(x0 + d)


if __name__ == "__main__":
    key = jax.random.PRNGKey(0)
    k_param, k_ids = jax.random.split(key)
    params = make_params(k_param)
    kparams = fold_params(params)

    B = 8
    ids = jax.random.randint(k_ids, (B, FEATURE_COUNT, IDS_PER_FEATURE),
                             0, VOCAB, dtype=jnp.int32)

    fwd = jax.jit(demo_module_forward)
    out = jax.block_until_ready(fwd(ids, params, kparams))

    ref = reference_forward(ids, params)
    assert out.shape == (B, D)
    # bf16 matmul operands (f32 accumulate) -> relaxed tolerance vs f32 ref.
    assert jnp.allclose(out, ref, atol=2e-2, rtol=2e-2), "mismatch vs reference"
    print("KERNEL_OK")
</pallas_src>

<mosaic_0001>
module attributes {stable_mosaic.version = 11 : i64} {
  func.func @_wdl_dense_kernel(%arg0: i32, %arg1: memref<8x64xf32, #tpu.memory_space<vmem>>, %arg2: memref<8x64xf32, #tpu.memory_space<vmem>>, %arg3: memref<64x1024xbf16, #tpu.memory_space<vmem>>, %arg4: memref<1x1024xf32, #tpu.memory_space<vmem>>, %arg5: memref<1024x512xbf16, #tpu.memory_space<vmem>>, %arg6: memref<1x512xf32, #tpu.memory_space<vmem>>, %arg7: memref<1x512xf32, #tpu.memory_space<vmem>>, %arg8: memref<1x1xf32, #tpu.memory_space<vmem>>, %arg9: memref<8x64xf32, #tpu.memory_space<vmem>>) attributes {dimension_semantics = [#tpu.dimension_semantics<parallel>], iteration_bounds = array<i64: 1>, scalar_prefetch = 0 : i64, scratch_operands = 0 : i64, tpu.core_type = #tpu.core_type<tc>, window_params = [{transform_indices = @transform_0, window_bounds = array<i64: 8, 64>}, {transform_indices = @transform_1, window_bounds = array<i64: 8, 64>}, {pipeline_mode = #tpu.pipeline_mode<synchronous>, transform_indices = @transform_2, window_bounds = array<i64: 64, 1024>}, {pipeline_mode = #tpu.pipeline_mode<synchronous>, transform_indices = @transform_3, window_bounds = array<i64: 1, 1024>}, {pipeline_mode = #tpu.pipeline_mode<synchronous>, transform_indices = @transform_4, window_bounds = array<i64: 1024, 512>}, {pipeline_mode = #tpu.pipeline_mode<synchronous>, transform_indices = @transform_5, window_bounds = array<i64: 1, 512>}, {pipeline_mode = #tpu.pipeline_mode<synchronous>, transform_indices = @transform_6, window_bounds = array<i64: 1, 512>}, {pipeline_mode = #tpu.pipeline_mode<synchronous>, transform_indices = @transform_7, window_bounds = array<i64: 1, 1>}, {transform_indices = @transform_8, window_bounds = array<i64: 8, 64>}]} {
    %c0 = arith.constant 0 : index
    %c0_0 = arith.constant 0 : index
    %0 = vector.load %arg2[%c0, %c0_0] : memref<8x64xf32, #tpu.memory_space<vmem>>, vector<8x64xf32>
    %1 = arith.truncf %0 : vector<8x64xf32> to vector<8x64xbf16>
    %c0_1 = arith.constant 0 : index
    %c0_2 = arith.constant 0 : index
    %2 = vector.load %arg3[%c0_1, %c0_2] : memref<64x1024xbf16, #tpu.memory_space<vmem>>, vector<64x1024xbf16>
    %cst = arith.constant dense<0.000000e+00> : vector<8x1024xf32>
    %3 = tpu.matmul %1, %2, %cst {dimension_numbers = #tpu.dot_dimension_numbers<[1], [0], [0], [1], [0, 0, 1, 1], [], []>} : vector<8x64xbf16>, vector<64x1024xbf16>, vector<8x1024xf32> -> vector<8x1024xf32>
    %c0_3 = arith.constant 0 : index
    %c0_4 = arith.constant 0 : index
    %4 = vector.load %arg4[%c0_3, %c0_4] : memref<1x1024xf32, #tpu.memory_space<vmem>>, vector<1x1024xf32>
    %5 = vector.broadcast %4 : vector<1x1024xf32> to vector<8x1024xf32>
    %6 = arith.addf %3, %5 : vector<8x1024xf32>
    %cst_5 = arith.constant 0.000000e+00 : f32
    %7 = vector.broadcast %cst_5 : f32 to vector<8x1024xf32>
    %8 = arith.maximumf %6, %7 : vector<8x1024xf32>
    %9 = arith.truncf %8 : vector<8x1024xf32> to vector<8x1024xbf16>
    %c0_6 = arith.constant 0 : index
    %c0_7 = arith.constant 0 : index
    %10 = vector.load %arg5[%c0_6, %c0_7] : memref<1024x512xbf16, #tpu.memory_space<vmem>>, vector<1024x512xbf16>
    %cst_8 = arith.constant dense<0.000000e+00> : vector<8x512xf32>
    %11 = tpu.matmul %9, %10, %cst_8 {dimension_numbers = #tpu.dot_dimension_numbers<[1], [0], [0], [1], [0, 0, 1, 1], [], []>} : vector<8x1024xbf16>, vector<1024x512xbf16>, vector<8x512xf32> -> vector<8x512xf32>
    %c0_9 = arith.constant 0 : index
    %c0_10 = arith.constant 0 : index
    %12 = vector.load %arg6[%c0_9, %c0_10] : memref<1x512xf32, #tpu.memory_space<vmem>>, vector<1x512xf32>
    %13 = vector.broadcast %12 : vector<1x512xf32> to vector<8x512xf32>
    %14 = arith.addf %11, %13 : vector<8x512xf32>
    %cst_11 = arith.constant 0.000000e+00 : f32
    %15 = vector.broadcast %cst_11 : f32 to vector<8x512xf32>
    %16 = arith.maximumf %14, %15 : vector<8x512xf32>
    %c0_12 = arith.constant 0 : index
    %c0_13 = arith.constant 0 : index
    %17 = vector.load %arg7[%c0_12, %c0_13] : memref<1x512xf32, #tpu.memory_space<vmem>>, vector<1x512xf32>
    %18 = vector.broadcast %17 : vector<1x512xf32> to vector<8x512xf32>
    %19 = arith.mulf %16, %18 : vector<8x512xf32>
    %cst_14 = arith.constant dense<0.000000e+00> : vector<8xf32>
    %20 = vector.multi_reduction <add>, %19, %cst_14 [1] : vector<8x512xf32> to vector<8xf32>
    %21 = vector.shape_cast %20 : vector<8xf32> to vector<8x1xf32>
    %c0_15 = arith.constant 0 : index
    %c0_16 = arith.constant 0 : index
    %22 = vector.load %arg8[%c0_15, %c0_16] : memref<1x1xf32, #tpu.memory_space<vmem>>, vector<1x1xf32>
    %23 = vector.broadcast %22 : vector<1x1xf32> to vector<8x1xf32>
    %24 = arith.addf %21, %23 : vector<8x1xf32>
    %c0_17 = arith.constant 0 : index
    %c0_18 = arith.constant 0 : index
    %25 = vector.load %arg1[%c0_17, %c0_18] : memref<8x64xf32, #tpu.memory_space<vmem>>, vector<8x64xf32>
    %26 = vector.broadcast %24 : vector<8x1xf32> to vector<8x64xf32>
    %27 = arith.addf %25, %26 : vector<8x64xf32>
    %28 = arith.negf %27 : vector<8x64xf32>
    %29 = math.exp %28 : vector<8x64xf32>
    %cst_19 = arith.constant 1.000000e+00 : f32
    %30 = vector.broadcast %cst_19 : f32 to vector<8x64xf32>
    %31 = arith.addf %30, %29 : vector<8x64xf32>
    %32 = arith.divf %30, %31 : vector<8x64xf32>
    %c0_20 = arith.constant 0 : index
    %c0_21 = arith.constant 0 : index
    %33 = vector.load %arg9[%c0_20, %c0_21] : memref<8x64xf32, #tpu.memory_space<vmem>>, vector<8x64xf32>
    tpu.vector_store %arg9[%c0_20, %c0_21], %32 {strides = array<i32>} : memref<8x64xf32, #tpu.memory_space<vmem>>, vector<8x64xf32>,
    return
  }
  func.func @transform_0(%arg0: i32) -> (i32, i32) {
    %c0_i32 = arith.constant 0 : i32
    %c0_i32_0 = arith.constant 0 : i32
    return %arg0, %c0_i32 : i32, i32
  }
  func.func @transform_1(%arg0: i32) -> (i32, i32) {
    %c0_i32 = arith.constant 0 : i32
    %c0_i32_0 = arith.constant 0 : i32
    return %arg0, %c0_i32 : i32, i32
  }
  func.func @transform_2(%arg0: i32) -> (i32, i32) {
    %c0_i32 = arith.constant 0 : i32
    %c0_i32_0 = arith.constant 0 : i32
    %c0_i32_1 = arith.constant 0 : i32
    return %c0_i32, %c0_i32_0 : i32, i32
  }
  func.func @transform_3(%arg0: i32) -> (i32, i32) {
    %c0_i32 = arith.constant 0 : i32
    %c0_i32_0 = arith.constant 0 : i32
    %c0_i32_1 = arith.constant 0 : i32
    return %c0_i32, %c0_i32_0 : i32, i32
  }
  func.func @transform_4(%arg0: i32) -> (i32, i32) {
    %c0_i32 = arith.constant 0 : i32
    %c0_i32_0 = arith.constant 0 : i32
    %c0_i32_1 = arith.constant 0 : i32
    return %c0_i32, %c0_i32_0 : i32, i32
  }
  func.func @transform_5(%arg0: i32) -> (i32, i32) {
    %c0_i32 = arith.constant 0 : i32
    %c0_i32_0 = arith.constant 0 : i32
    %c0_i32_1 = arith.constant 0 : i32
    return %c0_i32, %c0_i32_0 : i32, i32
  }
  func.func @transform_6(%arg0: i32) -> (i32, i32) {
    %c0_i32 = arith.constant 0 : i32
    %c0_i32_0 = arith.constant 0 : i32
    %c0_i32_1 = arith.constant 0 : i32
    return %c0_i32, %c0_i32_0 : i32, i32
  }
  func.func @transform_7(%arg0: i32) -> (i32, i32) {
    %c0_i32 = arith.constant 0 : i32
    %c0_i32_0 = arith.constant 0 : i32
    %c0_i32_1 = arith.constant 0 : i32
    return %c0_i32, %c0_i32_0 : i32, i32
  }
  func.func @transform_8(%arg0: i32) -> (i32, i32) {
    %c0_i32 = arith.constant 0 : i32
    %c0_i32_0 = arith.constant 0 : i32
    return %arg0, %c0_i32 : i32, i32
  }
}

</mosaic_0001>

<bundles_post_ra>
// kernel: demo_module_forward.1
= control target key start
LH: loop header
LB: loop body
LE: loop exit
PB: predicated region body
PF: predicated region fallthrough
CT: control target
= control target key end

     0   :  { %s5773_s0 = inlined_call_operand.vmem [shape: f32[8,64], index: 0, kind: input, shape index: {}]   ;;  %s5774_s1 = inlined_call_operand.vmem [shape: f32[8,64], index: 1, kind: input, shape index: {}]   ;;  %s5775_s2 = inlined_call_operand.vmem [shape: bf16[64,1024], index: 2, kind: input, shape index: {}]   ;;  %s5776_s3 = inlined_call_operand.vmem [shape: f32[1,1024], index: 3, kind: input, shape index: {}]   ;;  %s5777_s4 = inlined_call_operand.vmem [shape: bf16[1024,512], index: 4, kind: input, shape index: {}]   ;;  %s5778_s5 = inlined_call_operand.vmem [shape: f32[1,512], index: 5, kind: input, shape index: {}]   ;;  %s5779_s6 = inlined_call_operand.vmem [shape: f32[1,512], index: 6, kind: input, shape index: {}]   ;;  %s5780_s7 = inlined_call_operand.<no memory space> [shape: f32[1,1], index: 7, kind: input, shape index: {}]   ;;  %s5781_s8 = inlined_call_operand.hbm [shape: f32[8,64], index: 8, kind: output, shape index: {}]  }
   0x1   :  { %v13_v0 = vstv %s5780_s7 }
   0x2   :  { %14 = vst [vmem:[#allocation2] sm:$0x1] %v13_v0 }
   0x3   :  { %v2500_v1 = vld [vmem:[%s5775_s2 + $0xc0] sm:$0xf]  ;;  %v3587_v3 = vld [vmem:[%s5775_s2 + $0xc4] sm:$0xf]  ;;  %v2508_v6 = vld [vmem:[%s5775_s2 + $0xc8] sm:$0xf] }
   0x4   :  { %v3591_v2 = vld [vmem:[%s5775_s2 + $0xdc] sm:$0xf0]  ;;  %v2502_v5 = vld [vmem:[%s5775_s2 + $0xe0] sm:$0xf0]  ;;  %v3592_v7 = vld [vmem:[%s5775_s2 + $0xe4] sm:$0xf0] }
   0x5   :  { %v2501_v4 = vor.u32 %v3591_v2, %v2500_v1  ;;  %v2505_v8 = vor.u32 %v3587_v3, %v2502_v5  ;;  %v2509_v9 = vor.u32 %v3592_v7, %v2508_v6  ;;  %v3588_v10 = vld [vmem:[%s5775_s2 + $0xcc] sm:$0xf]  ;;  %v2468_v12 = vld [vmem:[%s5775_s2 + $0x80] sm:$0xf]  ;;  %v3579_v15 = vld [vmem:[%s5775_s2 + $0x84] sm:$0xf] }
   0x6   :  { %v2510_v11 = vld [vmem:[%s5775_s2 + $0xe8] sm:$0xf0]  ;;  %v3583_v14 = vld [vmem:[%s5775_s2 + $0x9c] sm:$0xf0]  ;;  %v2470_v16 = vld [vmem:[%s5775_s2 + $0xa0] sm:$0xf0] }
   0x7   :  { %253 = vmatpush.bf16.msra.mxu0 %v2501_v4  ;;  %v2513_v13 = vor.u32 %v3588_v10, %v2510_v11  ;;  %266 = vmatpush.bf16.msra.mxu1 %v2505_v8  ;;  %v2469_v17 = vor.u32 %v3583_v14, %v2468_v12  ;;  %v2473_v18 = vor.u32 %v3579_v15, %v2470_v16  ;;  %v2476_v19 = vld [vmem:[%s5775_s2 + $0x88] sm:$0xf]  ;;  %v3580_v21 = vld [vmem:[%s5775_s2 + $0x8c] sm:$0xf]  ;;  %v2436_v24 = vld [vmem:[%s5775_s2 + $0x40] sm:$0xf] }
   0x8   :  { %279 = vmatpush.bf16.msra.mxu2 %v2509_v9  ;;  %v3584_v20 = vld [vmem:[%s5775_s2 + $0xa4] sm:$0xf0]  ;;  %v2478_v23 = vld [vmem:[%s5775_s2 + $0xa8] sm:$0xf0]  ;;  %v3575_v25 = vld [vmem:[%s5775_s2 + $0x5c] sm:$0xf0] }
   0x9   :  { %292 = vmatpush.bf16.msra.mxu3 %v2513_v13  ;;  %v2477_v22 = vor.u32 %v3584_v20, %v2476_v19  ;;  %v2481_v26 = vor.u32 %v3580_v21, %v2478_v23  ;;  %v3571_v27 = vld [vmem:[%s5775_s2 + $0x44] sm:$0xf]  ;;  %v2444_v29 = vld [vmem:[%s5775_s2 + $0x48] sm:$0xf]  ;;  %v2437_v30 = vor.u32 %v3575_v25, %v2436_v24  ;;  %v3572_v32 = vld [vmem:[%s5775_s2 + $0x4c] sm:$0xf] }
   0xa   :  { %v2438_v28 = vld [vmem:[%s5775_s2 + $0x60] sm:$0xf0]  ;;  %v3576_v31 = vld [vmem:[%s5775_s2 + $0x64] sm:$0xf0]  ;;  %v2446_v33 = vld [vmem:[%s5775_s2 + $0x68] sm:$0xf0] }
   0xb   :  { %254 = vmatpush.bf16.msra.mxu0 %v2469_v17  ;;  %267 = vmatpush.bf16.msra.mxu1 %v2473_v18  ;;  %v2441_v34 = vor.u32 %v3571_v27, %v2438_v28  ;;  %v2445_v35 = vor.u32 %v3576_v31, %v2444_v29  ;;  %v2404_v36 = vld [vmem:[%s5775_s2] sm:$0xf]  ;;  %v3563_v38 = vld [vmem:[%s5775_s2 + $0x4] sm:$0xf]  ;;  %v2449_v39 = vor.u32 %v3572_v32, %v2446_v33  ;;  %v2412_v41 = vld [vmem:[%s5775_s2 + $0x8] sm:$0xf] }
   0xc   :  { %280 = vmatpush.bf16.msra.mxu2 %v2477_v22  ;;  %v3567_v37 = vld [vmem:[%s5775_s2 + $0x1c] sm:$0xf0]  ;;  %v2406_v40 = vld [vmem:[%s5775_s2 + $0x20] sm:$0xf0]  ;;  %v3568_v42 = vld [vmem:[%s5775_s2 + $0x24] sm:$0xf0] }
   0xd   :  { %293 = vmatpush.bf16.msra.mxu3 %v2481_v26  ;;  %v3564_v43 = vld [vmem:[%s5775_s2 + $0xc] sm:$0xf]  ;;  %v33_v45 = vld [vmem:[%s5774_s1] sm:$0xff]  ;;  %v2405_v46 = vor.u32 %v3567_v37, %v2404_v36  ;;  %v2516_v47 = vld [vmem:[%s5775_s2 + $0xd0] sm:$0xf]  ;;  %v2409_v50 = vor.u32 %v3563_v38, %v2406_v40  ;;  %v2413_v51 = vor.u32 %v3568_v42, %v2412_v41  ;;  %vm245_vm0 = vcmask 523264  }
   0xe   :  { %v2414_v44 = vld [vmem:[%s5775_s2 + $0x28] sm:$0xf0]  ;;  %v3593_v48 = vld [vmem:[%s5775_s2 + $0xec] sm:$0xf0]  ;;  %v3589_v49 = vld [vmem:[%s5775_s2 + $0xd4] sm:$0xf]  ;;  %v4055_v58 = vpack.c.bf16 %v33_v45, %v33_v45 }
   0xf   :  { %255 = vmatpush.bf16.msra.mxu0 %v2437_v30  ;;  %268 = vmatpush.bf16.msra.mxu1 %v2441_v34  ;;  %v2518_v52 = vld [vmem:[%s5775_s2 + $0xf0] sm:$0xf0]  ;;  %v2417_v53 = vor.u32 %v3564_v43, %v2414_v44  ;;  %v2517_v54 = vor.u32 %v3593_v48, %v2516_v47  ;;  %v2524_v55 = vld [vmem:[%s5775_s2 + $0xd8] sm:$0xf]  ;;  %v3590_v57 = vld [vmem:[%s5775_s2 + $0xdc] sm:$0xf] }
  0x10   :  { %281 = vmatpush.bf16.msra.mxu2 %v2445_v35  ;;  %v3594_v56 = vld [vmem:[%s5775_s2 + $0xf4] sm:$0xf0]  ;;  %v2521_v59 = vor.u32 %v3589_v49, %v2518_v52  ;;  %v2526_v60 = vld [vmem:[%s5775_s2 + $0xf8] sm:$0xf0]  ;;  %v2484_v61 = vld [vmem:[%s5775_s2 + $0x90] sm:$0xf] }
  0x11   :  { %294 = vmatpush.bf16.msra.mxu3 %v2449_v39  ;;  %v3585_v62 = vld [vmem:[%s5775_s2 + $0xac] sm:$0xf0]  ;;  %v3581_v63 = vld [vmem:[%s5775_s2 + $0x94] sm:$0xf]  ;;  %v2525_v1 = vor.u32 %v3594_v56, %v2524_v55  ;;  %v2529_v2 = vor.u32 %v3590_v57, %v2526_v60  ;;  %v2492_v4 = vld [vmem:[%s5775_s2 + $0x98] sm:$0xf] }
  0x12   :  { %v2486_v0 = vld [vmem:[%s5775_s2 + $0xb0] sm:$0xf0]  ;;  %v2485_v3 = vor.u32 %v3585_v62, %v2484_v61  ;;  %v3586_v5 = vld [vmem:[%s5775_s2 + $0xb4] sm:$0xf0]  ;;  %v3582_v6 = vld [vmem:[%s5775_s2 + $0x9c] sm:$0xf] }
  0x13   :  { %256 = vmatpush.bf16.msra.mxu0 %v2405_v46  ;;  %269 = vmatpush.bf16.msra.mxu1 %v2409_v50  ;;  %v2489_v7 = vor.u32 %v3581_v63, %v2486_v0  ;;  %v2494_v8 = vld [vmem:[%s5775_s2 + $0xb8] sm:$0xf0]  ;;  %v2452_v9 = vld [vmem:[%s5775_s2 + $0x50] sm:$0xf]  ;;  %v3573_v11 = vld [vmem:[%s5775_s2 + $0x54] sm:$0xf]  ;;  %v2493_v13 = vor.u32 %v3586_v5, %v2492_v4 }
  0x14   :  { %282 = vmatpush.bf16.msra.mxu2 %v2413_v51  ;;  %v3577_v10 = vld [vmem:[%s5775_s2 + $0x6c] sm:$0xf0]  ;;  %v2454_v12 = vld [vmem:[%s5775_s2 + $0x70] sm:$0xf0]  ;;  %v2460_v14 = vld [vmem:[%s5775_s2 + $0x58] sm:$0xf]  ;;  %v2497_v15 = vor.u32 %v3582_v6, %v2494_v8 }
  0x15   :  { %295 = vmatpush.bf16.msra.mxu3 %v2417_v53  ;;  %v2453_v16 = vor.u32 %v3577_v10, %v2452_v9  ;;  %v3578_v17 = vld [vmem:[%s5775_s2 + $0x74] sm:$0xf0]  ;;  %v3574_v18 = vld [vmem:[%s5775_s2 + $0x5c] sm:$0xf]  ;;  %v2457_v20 = vor.u32 %v3573_v11, %v2454_v12  ;;  %v2420_v21 = vld [vmem:[%s5775_s2 + $0x10] sm:$0xf] }
  0x16   :  { %2530 = vmatmul.msk.bf16.vlgmr.msra.gmra.mxu0 %vm245_vm0, %v4055_v58  ;;  %2531 = vmatmul.msk.bf16.vlgmr.msra.gmra.mxu1 %vm245_vm0, %v4055_v58  ;;  %v2462_v19 = vld [vmem:[%s5775_s2 + $0x78] sm:$0xf0]  ;;  %v3569_v22 = vld [vmem:[%s5775_s2 + $0x2c] sm:$0xf0]  ;;  %v3565_v23 = vld [vmem:[%s5775_s2 + $0x14] sm:$0xf]  ;;  %v2461_v27 = vor.u32 %v3578_v17, %v2460_v14 }
  0x17   :  { %305 = vmatpush.bf16.msrb.mxu0 %v2517_v54  ;;  %318 = vmatpush.bf16.msrb.mxu1 %v2521_v59  ;;  %v2422_v24 = vld [vmem:[%s5775_s2 + $0x30] sm:$0xf0]  ;;  %v2652_v25 = vld [vmem:[%s5777_s4 + $0xe0] sm:$0xf]  ;;  %v3625_v26 = vld [vmem:[%s5777_s4 + $0xec] sm:$0xf0]  ;;  %v2465_v30 = vor.u32 %v3574_v18, %v2462_v19  ;;  %v2421_v31 = vor.u32 %v3569_v22, %v2420_v21 }
  0x18   :  { %2532 = vmatmul.msk.bf16.vlgmr.msra.gmra.mxu2 %vm245_vm0, %v4055_v58  ;;  %2533 = vmatmul.msk.bf16.vlgmr.msra.gmra.mxu3 %vm245_vm0, %v4055_v58  ;;  %v2780_v28 = vld [vmem:[%s5777_s4 + $0x1e0] sm:$0xf]  ;;  %v3657_v29 = vld [vmem:[%s5777_s4 + $0x1ec] sm:$0xf0]  ;;  %v2428_v32 = vld [vmem:[%s5775_s2 + $0x18] sm:$0xf]  ;;  %v2425_v35 = vor.u32 %v3565_v23, %v2422_v24  ;;  %v2653_v37 = vor.u32 %v3625_v26, %v2652_v25 }
  0x19   :  { %331 = vmatpush.bf16.msrb.mxu2 %v2525_v1  ;;  %344 = vmatpush.bf16.msrb.mxu3 %v2529_v2  ;;  %v3570_v33 = vld [vmem:[%s5775_s2 + $0x34] sm:$0xf0]  ;;  %v3566_v34 = vld [vmem:[%s5775_s2 + $0x1c] sm:$0xf]  ;;  %v2908_v38 = vld [vmem:[%s5777_s4 + $0x2e0] sm:$0xf]  ;;  %v2781_v40 = vor.u32 %v3657_v29, %v2780_v28 }
  0x1a   :  { %v2430_v36 = vld [vmem:[%s5775_s2 + $0x38] sm:$0xf0]  ;;  %v3689_v39 = vld [vmem:[%s5777_s4 + $0x2ec] sm:$0xf0]  ;;  %v3036_v41 = vld [vmem:[%s5777_s4 + $0x3e0] sm:$0xf]  ;;  %v2429_v43 = vor.u32 %v3570_v33, %v2428_v32 }
  0x1b   :  { %306 = vmatpush.bf16.msrb.mxu0 %v2485_v3  ;;  %319 = vmatpush.bf16.msrb.mxu1 %v2489_v7  ;;  %v3721_v42 = vld [vmem:[%s5777_s4 + $0x3ec] sm:$0xf0]  ;;  %v2433_v44 = vor.u32 %v3566_v34, %v2430_v36  ;;  %v2636_v45 = vld [vmem:[%s5777_s4 + $0xc0] sm:$0xf]  ;;  %v2909_v48 = vor.u32 %v3689_v39, %v2908_v38 }
  0x1c   :  { %v3621_v46 = vld [vmem:[%s5777_s4 + $0xcc] sm:$0xf0]  ;;  %v2764_v47 = vld [vmem:[%s5777_s4 + $0x1c0] sm:$0xf]  ;;  %v3037_v50 = vor.u32 %v3721_v42, %v3036_v41 }
  0x1d   :  { %332 = vmatpush.bf16.msrb.mxu2 %v2493_v13  ;;  %345 = vmatpush.bf16.msrb.mxu3 %v2497_v15  ;;  %v3653_v49 = vld [vmem:[%s5777_s4 + $0x1cc] sm:$0xf0]  ;;  %v2892_v51 = vld [vmem:[%s5777_s4 + $0x2c0] sm:$0xf]  ;;  %v2637_v55 = vor.u32 %v3621_v46, %v2636_v45 }
  0x1e   :  { %v3685_v52 = vld [vmem:[%s5777_s4 + $0x2cc] sm:$0xf0]  ;;  %v3020_v53 = vld [vmem:[%s5777_s4 + $0x3c0] sm:$0xf]  ;;  %v2765_v56 = vor.u32 %v3653_v49, %v2764_v47 }
  0x1f   :  { %307 = vmatpush.bf16.msrb.mxu0 %v2453_v16  ;;  %320 = vmatpush.bf16.msrb.mxu1 %v2457_v20  ;;  %v3717_v54 = vld [vmem:[%s5777_s4 + $0x3cc] sm:$0xf0]  ;;  %v2620_v57 = vld [vmem:[%s5777_s4 + $0xa0] sm:$0xf]  ;;  %v2893_v61 = vor.u32 %v3685_v52, %v2892_v51 }
  0x20   :  { %v3617_v59 = vld [vmem:[%s5777_s4 + $0xac] sm:$0xf0]  ;;  %v2748_v60 = vld [vmem:[%s5777_s4 + $0x1a0] sm:$0xf]  ;;  %v3021_v63 = vor.u32 %v3717_v54, %v3020_v53 }
  0x21   :  { %333 = vmatpush.bf16.msrb.mxu2 %v2461_v27  ;;  %346 = vmatpush.bf16.msrb.mxu3 %v2465_v30  ;;  %v3649_v62 = vld [vmem:[%s5777_s4 + $0x1ac] sm:$0xf0]  ;;  %v2876_v0 = vld [vmem:[%s5777_s4 + $0x2a0] sm:$0xf]  ;;  %v2621_v4 = vor.u32 %v3617_v59, %v2620_v57 }
  0x22   :  { %v3681_v1 = vld [vmem:[%s5777_s4 + $0x2ac] sm:$0xf0]  ;;  %v3004_v2 = vld [vmem:[%s5777_s4 + $0x3a0] sm:$0xf]  ;;  %v2749_v5 = vor.u32 %v3649_v62, %v2748_v60 }
  0x23   :  { %308 = vmatpush.bf16.msrb.mxu0 %v2421_v31  ;;  %321 = vmatpush.bf16.msrb.mxu1 %v2425_v35  ;;  %v3713_v3 = vld [vmem:[%s5777_s4 + $0x3ac] sm:$0xf0]  ;;  %v2604_v6 = vld [vmem:[%s5777_s4 + $0x80] sm:$0xf]  ;;  %v2877_v9 = vor.u32 %v3681_v1, %v2876_v0 }
  0x24   :  { %v3613_v7 = vld [vmem:[%s5777_s4 + $0x8c] sm:$0xf0]  ;;  %v2732_v8 = vld [vmem:[%s5777_s4 + $0x180] sm:$0xf]  ;;  %v3005_v10 = vor.u32 %v3713_v3, %v3004_v2 }
  0x25   :  { %334 = vmatpush.bf16.msrb.mxu2 %v2429_v43  ;;  %347 = vmatpush.bf16.msrb.mxu3 %v2433_v44  ;;  %v2860_v11 = vld [vmem:[%s5777_s4 + $0x280] sm:$0xf]  ;;  %v3677_v12 = vld [vmem:[%s5777_s4 + $0x28c] sm:$0xf0]  ;;  %v2605_v15 = vor.u32 %v3613_v7, %v2604_v6 }
  0x26   :  { %2534 = vmatmul.msk.bf16.vlgmr.msrb.gmra.mxu0 %vm245_vm0, %v4055_v58  ;;  %2535 = vmatmul.msk.bf16.vlgmr.msrb.gmra.mxu1 %vm245_vm0, %v4055_v58  ;;  %v2988_v13 = vld [vmem:[%s5777_s4 + $0x380] sm:$0xf]  ;;  %v3709_v14 = vld [vmem:[%s5777_s4 + $0x38c] sm:$0xf0]  ;;  %v2861_v20 = vor.u32 %v3677_v12, %v2860_v11 }
  0x27   :  { %1915 = vmatpush.bf16.msra.mxu0 %v2653_v37  ;;  %1928 = vmatpush.bf16.msra.mxu1 %v2781_v40  ;;  %v2588_v17 = vld [vmem:[%s5777_s4 + $0x60] sm:$0xf]  ;;  %v3609_v18 = vld [vmem:[%s5777_s4 + $0x6c] sm:$0xf0]  ;;  %v2989_v22 = vor.u32 %v3709_v14, %v2988_v13 }
  0x28   :  { %2536 = vmatmul.msk.bf16.vlgmr.msrb.gmra.mxu2 %vm245_vm0, %v4055_v58  ;;  %2537 = vmatmul.msk.bf16.vlgmr.msrb.gmra.mxu3 %vm245_vm0, %v4055_v58  ;;  %v3645_v58 = vld [vmem:[%s5777_s4 + $0x18c] sm:$0xf0]  ;;  %v2716_v19 = vld [vmem:[%s5777_s4 + $0x160] sm:$0xf]  ;;  %v2589_v27 = vor.u32 %v3609_v18, %v2588_v17 }
  0x29   :  { %1941 = vmatpush.bf16.msra.mxu2 %v2909_v48  ;;  %1954 = vmatpush.bf16.msra.mxu3 %v3037_v50  ;;  %v2733_v16 = vor.u32 %v3645_v58, %v2732_v8  ;;  %v3641_v21 = vld [vmem:[%s5777_s4 + $0x16c] sm:$0xf0]  ;;  %v2844_v23 = vld [vmem:[%s5777_s4 + $0x260] sm:$0xf] }
  0x2a   :  { %v3673_v24 = vld [vmem:[%s5777_s4 + $0x26c] sm:$0xf0]  ;;  %v2972_v25 = vld [vmem:[%s5777_s4 + $0x360] sm:$0xf]  ;;  %v2717_v28 = vor.u32 %v3641_v21, %v2716_v19 }
  0x2b   :  { %1916 = vmatpush.bf16.msra.mxu0 %v2637_v55  ;;  %1929 = vmatpush.bf16.msra.mxu1 %v2765_v56  ;;  %v3705_v26 = vld [vmem:[%s5777_s4 + $0x36c] sm:$0xf0]  ;;  %v2572_v29 = vld [vmem:[%s5777_s4 + $0x40] sm:$0xf]  ;;  %v2845_v32 = vor.u32 %v3673_v24, %v2844_v23 }
  0x2c   :  { %v3605_v30 = vld [vmem:[%s5777_s4 + $0x4c] sm:$0xf0]  ;;  %v2700_v31 = vld [vmem:[%s5777_s4 + $0x140] sm:$0xf]  ;;  %v2973_v34 = vor.u32 %v3705_v26, %v2972_v25 }
  0x2d   :  { %1942 = vmatpush.bf16.msra.mxu2 %v2893_v61  ;;  %1955 = vmatpush.bf16.msra.mxu3 %v3021_v63  ;;  %v3637_v33 = vld [vmem:[%s5777_s4 + $0x14c] sm:$0xf0]  ;;  %v2828_v35 = vld [vmem:[%s5777_s4 + $0x240] sm:$0xf]  ;;  %v2573_v39 = vor.u32 %v3605_v30, %v2572_v29 }
  0x2e   :  { %v3669_v36 = vld [vmem:[%s5777_s4 + $0x24c] sm:$0xf0]  ;;  %v2956_v37 = vld [vmem:[%s5777_s4 + $0x340] sm:$0xf]  ;;  %v2701_v40 = vor.u32 %v3637_v33, %v2700_v31 }
  0x2f   :  { %1917 = vmatpush.bf16.msra.mxu0 %v2621_v4  ;;  %1930 = vmatpush.bf16.msra.mxu1 %v2749_v5  ;;  %v3701_v38 = vld [vmem:[%s5777_s4 + $0x34c] sm:$0xf0]  ;;  %v2556_v41 = vld [vmem:[%s5777_s4 + $0x20] sm:$0xf]  ;;  %v2829_v44 = vor.u32 %v3669_v36, %v2828_v35 }
  0x30   :  { %v3601_v42 = vld [vmem:[%s5777_s4 + $0x2c] sm:$0xf0]  ;;  %v2684_v43 = vld [vmem:[%s5777_s4 + $0x120] sm:$0xf]  ;;  %v2957_v46 = vor.u32 %v3701_v38, %v2956_v37 }
  0x31   :  { %1943 = vmatpush.bf16.msra.mxu2 %v2877_v9  ;;  %1956 = vmatpush.bf16.msra.mxu3 %v3005_v10  ;;  %v3633_v45 = vld [vmem:[%s5777_s4 + $0x12c] sm:$0xf0]  ;;  %v2812_v47 = vld [vmem:[%s5777_s4 + $0x220] sm:$0xf]  ;;  %v2557_v51 = vor.u32 %v3601_v42, %v2556_v41 }
  0x32   :  { %v3665_v48 = vld [vmem:[%s5777_s4 + $0x22c] sm:$0xf0]  ;;  %v2940_v49 = vld [vmem:[%s5777_s4 + $0x320] sm:$0xf]  ;;  %v2685_v55 = vor.u32 %v3633_v45, %v2684_v43 }
  0x33   :  { %1918 = vmatpush.bf16.msra.mxu0 %v2605_v15  ;;  %1931 = vmatpush.bf16.msra.mxu1 %v2733_v16  ;;  %v3697_v50 = vld [vmem:[%s5777_s4 + $0x32c] sm:$0xf0]  ;;  %v2540_v52 = vld [vmem:[%s5777_s4] sm:$0xf]  ;;  %v2813_v60 = vor.u32 %v3665_v48, %v2812_v47 }
  0x34   :  { %v3597_v53 = vld [vmem:[%s5777_s4 + $0xc] sm:$0xf0]  ;;  %v2668_v54 = vld [vmem:[%s5777_s4 + $0x100] sm:$0xf]  ;;  %v2941_v63 = vor.u32 %v3697_v50, %v2940_v49 }
  0x35   :  { %1944 = vmatpush.bf16.msra.mxu2 %v2861_v20  ;;  %1957 = vmatpush.bf16.msra.mxu3 %v2989_v22  ;;  %v3629_v56 = vld [vmem:[%s5777_s4 + $0x10c] sm:$0xf0]  ;;  %v3164_v57 = vld [vmem:[%s5777_s4 + $0x4e0] sm:$0xf]  ;;  %v2541_v4 = vor.u32 %v3597_v53, %v2540_v52 }
  0x36   :  { %v3753_v59 = vld [vmem:[%s5777_s4 + $0x4ec] sm:$0xf0]  ;;  %v3292_v61 = vld [vmem:[%s5777_s4 + $0x5e0] sm:$0xf]  ;;  %v2669_v7 = vor.u32 %v3629_v56, %v2668_v54 }
  0x37   :  { %1919 = vmatpush.bf16.msra.mxu0 %v2589_v27  ;;  %1932 = vmatpush.bf16.msra.mxu1 %v2717_v28  ;;  %v3785_v62 = vld [vmem:[%s5777_s4 + $0x5ec] sm:$0xf0]  ;;  %v2796_v0 = vld [vmem:[%s5777_s4 + $0x200] sm:$0xf]  ;;  %v3165_v8 = vor.u32 %v3753_v59, %v3164_v57 }
  0x38   :  { %v3661_v1 = vld [vmem:[%s5777_s4 + $0x20c] sm:$0xf0]  ;;  %v2924_v2 = vld [vmem:[%s5777_s4 + $0x300] sm:$0xf] }
  0x39   :  { %1945 = vmatpush.bf16.msra.mxu2 %v2845_v32  ;;  %1958 = vmatpush.bf16.msra.mxu3 %v2973_v34  ;;  %v3693_v3 = vld [vmem:[%s5777_s4 + $0x30c] sm:$0xf0]  ;;  %v3420_v5 = vld [vmem:[%s5777_s4 + $0x6e0] sm:$0xf] }
  0x3a   :  { %v3817_v6 = vld [vmem:[%s5777_s4 + $0x6ec] sm:$0xf0]  ;;  %v3548_v9 = vld [vmem:[%s5777_s4 + $0x7e0] sm:$0xf] }
  0x3b   :  { %1920 = vmatpush.bf16.msra.mxu0 %v2573_v39  ;;  %1933 = vmatpush.bf16.msra.mxu1 %v2701_v40  ;;  %v3849_v58 = vld [vmem:[%s5777_s4 + $0x7ec] sm:$0xf0] }
  0x3d   :  { %1946 = vmatpush.bf16.msra.mxu2 %v2829_v44  ;;  %1959 = vmatpush.bf16.msra.mxu3 %v2957_v46 }
  0x3f   :  { %1921 = vmatpush.bf16.msra.mxu0 %v2557_v51  ;;  %1934 = vmatpush.bf16.msra.mxu1 %v2685_v55 }
  0x41   :  { %1947 = vmatpush.bf16.msra.mxu2 %v2813_v60 }
  0x42   :  { %15 = vsyncpa [#allocation4], 0  ;;  %v3293_v10 = vor.u32 %v3785_v62, %v3292_v61  ;;  %1960 = vmatpush.bf16.msra.mxu3 %v2941_v63  ;;  %v3148_v11 = vld [vmem:[%s5777_s4 + $0x4c0] sm:$0xf]  ;;  %v3749_v12 = vld [vmem:[%s5777_s4 + $0x4cc] sm:$0xf0]  ;;  %v2797_v13 = vor.u32 %v3661_v1, %v2796_v0  ;;  %v2925_v16 = vor.u32 %v3693_v3, %v2924_v2  ;;  %v3421_v17 = vor.u32 %v3817_v6, %v3420_v5 }
  0x43   :  { %v3276_v14 = vld [vmem:[%s5777_s4 + $0x5c0] sm:$0xf]  ;;  %v3781_v15 = vld [vmem:[%s5777_s4 + $0x5cc] sm:$0xf0]  ;;  %1922 = vmatpush.bf16.msra.mxu0 %v2541_v4  ;;  %v3549_v18 = vor.u32 %v3849_v58, %v3548_v9  ;;  %1935 = vmatpush.bf16.msra.mxu1 %v2669_v7  ;;  %v3149_v21 = vor.u32 %v3749_v12, %v3148_v11  ;;  %s3886_s2 = smov [#allocation3]  }
  0x44   :  { %v3404_v19 = vld [vmem:[%s5777_s4 + $0x6c0] sm:$0xf]  ;;  %v3813_v20 = vld [vmem:[%s5777_s4 + $0x6cc] sm:$0xf0]  ;;  %v3277_v24 = vor.u32 %v3781_v15, %v3276_v14  ;;  %s2391_s11 = sshll.u32 %s3886_s2, 4  ;;  %s2392_s11 = int_to_ptr.vmem [resolvable:$true] %s2391_s11 }
  0x45   :  { %v3532_v22 = vld [vmem:[%s5777_s4 + $0x7c0] sm:$0xf]  ;;  %v3845_v23 = vld [vmem:[%s5777_s4 + $0x7cc] sm:$0xf0]  ;;  %1948 = vmatpush.bf16.msra.mxu2 %v2797_v13  ;;  %v3405_v29 = vor.u32 %v3813_v20, %v3404_v19 }
  0x46   :  { %v3132_v25 = vld [vmem:[%s5777_s4 + $0x4a0] sm:$0xf]  ;;  %v3745_v26 = vld [vmem:[%s5777_s4 + $0x4ac] sm:$0xf0]  ;;  %1961 = vmatpush.bf16.msra.mxu3 %v2925_v16  ;;  %v3533_v30 = vor.u32 %v3845_v23, %v3532_v22 }
  0x47   :  { %1967 = vmatpush.bf16.msrb.mxu0 %v3165_v8  ;;  %1980 = vmatpush.bf16.msrb.mxu1 %v3293_v10  ;;  %v3260_v27 = vld [vmem:[%s5777_s4 + $0x5a0] sm:$0xf]  ;;  %v3777_v28 = vld [vmem:[%s5777_s4 + $0x5ac] sm:$0xf0]  ;;  %v3133_v33 = vor.u32 %v3745_v26, %v3132_v25 }
  0x48   :  { %v3388_v31 = vld [vmem:[%s5777_s4 + $0x6a0] sm:$0xf]  ;;  %v3809_v32 = vld [vmem:[%s5777_s4 + $0x6ac] sm:$0xf0]  ;;  %v3261_v36 = vor.u32 %v3777_v28, %v3260_v27 }
  0x49   :  { %1993 = vmatpush.bf16.msrb.mxu2 %v3421_v17  ;;  %v3516_v34 = vld [vmem:[%s5777_s4 + $0x7a0] sm:$0xf]  ;;  %v3841_v35 = vld [vmem:[%s5777_s4 + $0x7ac] sm:$0xf0]  ;;  %v3389_v41 = vor.u32 %v3809_v32, %v3388_v31 }
  0x4a   :  { %2006 = vmatpush.bf16.msrb.mxu3 %v3549_v18  ;;  %v3116_v37 = vld [vmem:[%s5777_s4 + $0x480] sm:$0xf]  ;;  %v3741_v38 = vld [vmem:[%s5777_s4 + $0x48c] sm:$0xf0]  ;;  %v3517_v42 = vor.u32 %v3841_v35, %v3516_v34 }
  0x4b   :  { %1968 = vmatpush.bf16.msrb.mxu0 %v3149_v21  ;;  %1981 = vmatpush.bf16.msrb.mxu1 %v3277_v24  ;;  %v3244_v39 = vld [vmem:[%s5777_s4 + $0x580] sm:$0xf]  ;;  %v3773_v40 = vld [vmem:[%s5777_s4 + $0x58c] sm:$0xf0]  ;;  %v3117_v45 = vor.u32 %v3741_v38, %v3116_v37 }
  0x4c   :  { %v3372_v43 = vld [vmem:[%s5777_s4 + $0x680] sm:$0xf]  ;;  %v3805_v44 = vld [vmem:[%s5777_s4 + $0x68c] sm:$0xf0]  ;;  %v3245_v48 = vor.u32 %v3773_v40, %v3244_v39 }
  0x4d   :  { %1994 = vmatpush.bf16.msrb.mxu2 %v3405_v29  ;;  %v3500_v46 = vld [vmem:[%s5777_s4 + $0x780] sm:$0xf]  ;;  %v3837_v47 = vld [vmem:[%s5777_s4 + $0x78c] sm:$0xf0]  ;;  %v3373_v53 = vor.u32 %v3805_v44, %v3372_v43  ;;  %v3655_v44 = vld [vmem:[%s5777_s4 + $0x1e4] sm:$0xf] }
  0x4e   :  { %2007 = vmatpush.bf16.msrb.mxu3 %v3533_v30  ;;  %v3100_v49 = vld [vmem:[%s5777_s4 + $0x460] sm:$0xf]  ;;  %v3737_v50 = vld [vmem:[%s5777_s4 + $0x46c] sm:$0xf0]  ;;  %v3501_v54 = vor.u32 %v3837_v47, %v3500_v46 }
  0x4f   :  { %1969 = vmatpush.bf16.msrb.mxu0 %v3133_v33  ;;  %1982 = vmatpush.bf16.msrb.mxu1 %v3261_v36  ;;  %v3228_v51 = vld [vmem:[%s5777_s4 + $0x560] sm:$0xf]  ;;  %v3769_v52 = vld [vmem:[%s5777_s4 + $0x56c] sm:$0xf0]  ;;  %v3101_v55 = vor.u32 %v3737_v50, %v3100_v49 }
  0x50   :  { %v3229_v56 = vor.u32 %v3769_v52, %v3228_v51  ;;  %v3084_v57 = vld [vmem:[%s5777_s4 + $0x440] sm:$0xf]  ;;  %v3733_v59 = vld [vmem:[%s5777_s4 + $0x44c] sm:$0xf0] }
  0x51   :  { %1995 = vmatpush.bf16.msrb.mxu2 %v3389_v41  ;;  %v3212_v60 = vld [vmem:[%s5777_s4 + $0x540] sm:$0xf]  ;;  %v3765_v61 = vld [vmem:[%s5777_s4 + $0x54c] sm:$0xf0]  ;;  %v3085_v62 = vor.u32 %v3733_v59, %v3084_v57  ;;  %v3623_v41 = vld [vmem:[%s5777_s4 + $0xe4] sm:$0xf] }
  0x52   :  { %2008 = vmatpush.bf16.msrb.mxu3 %v3517_v42  ;;  %v3213_v63 = vor.u32 %v3765_v61, %v3212_v60  ;;  %v3356_v0 = vld [vmem:[%s5777_s4 + $0x660] sm:$0xf]  ;;  %v3801_v1 = vld [vmem:[%s5777_s4 + $0x66c] sm:$0xf0]  ;;  %v2654_v42 = vld [vmem:[%s5777_s4 + $0xf0] sm:$0xf0] }
  0x53   :  { %1970 = vmatpush.bf16.msrb.mxu0 %v3117_v45  ;;  %1983 = vmatpush.bf16.msrb.mxu1 %v3245_v48  ;;  %v3484_v2 = vld [vmem:[%s5777_s4 + $0x760] sm:$0xf]  ;;  %v3357_v3 = vor.u32 %v3801_v1, %v3356_v0  ;;  %v3833_v4 = vld [vmem:[%s5777_s4 + $0x76c] sm:$0xf0]  ;;  %v2782_v45 = vld [vmem:[%s5777_s4 + $0x1f0] sm:$0xf0]  ;;  %v2657_v49 = vor.u32 %v3623_v41, %v2654_v42 }
  0x54   :  { %v3485_v5 = vor.u32 %v3833_v4, %v3484_v2  ;;  %v3068_v6 = vld [vmem:[%s5777_s4 + $0x420] sm:$0xf]  ;;  %v3729_v7 = vld [vmem:[%s5777_s4 + $0x42c] sm:$0xf0]  ;;  %v2785_v52 = vor.u32 %v3655_v44, %v2782_v45  ;;  %v2766_v57 = vld [vmem:[%s5777_s4 + $0x1d0] sm:$0xf0] }
  0x55   :  { %1996 = vmatpush.bf16.msrb.mxu2 %v3373_v53  ;;  %v3069_v8 = vor.u32 %v3729_v7, %v3068_v6  ;;  %v3196_v9 = vld [vmem:[%s5777_s4 + $0x520] sm:$0xf]  ;;  %v3761_v58 = vld [vmem:[%s5777_s4 + $0x52c] sm:$0xf0]  ;;  %v3619_v53 = vld [vmem:[%s5777_s4 + $0xc4] sm:$0xf] }
  0x56   :  { %2009 = vmatpush.bf16.msrb.mxu3 %v3501_v54  ;;  %v3197_v10 = vor.u32 %v3761_v58, %v3196_v9  ;;  %v3340_v11 = vld [vmem:[%s5777_s4 + $0x640] sm:$0xf]  ;;  %v3797_v12 = vld [vmem:[%s5777_s4 + $0x64c] sm:$0xf0]  ;;  %v2638_v54 = vld [vmem:[%s5777_s4 + $0xd0] sm:$0xf0] }
  0x57   :  { %1971 = vmatpush.bf16.msrb.mxu0 %v3101_v55  ;;  %1984 = vmatpush.bf16.msrb.mxu1 %v3229_v56  ;;  %v3468_v13 = vld [vmem:[%s5777_s4 + $0x740] sm:$0xf]  ;;  %v3341_v14 = vor.u32 %v3797_v12, %v3340_v11  ;;  %v3829_v15 = vld [vmem:[%s5777_s4 + $0x74c] sm:$0xf0]  ;;  %v3651_v56 = vld [vmem:[%s5777_s4 + $0x1c4] sm:$0xf] }
  0x58   :  { %v3469_v16 = vor.u32 %v3829_v15, %v3468_v13  ;;  %v3052_v17 = vld [vmem:[%s5777_s4 + $0x400] sm:$0xf]  ;;  %v3725_v18 = vld [vmem:[%s5777_s4 + $0x40c] sm:$0xf0]  ;;  %v3687_v0 = vld [vmem:[%s5777_s4 + $0x2e4] sm:$0xf] }
  0x59   :  { %1997 = vmatpush.bf16.msrb.mxu2 %v3357_v3  ;;  %v3180_v19 = vld [vmem:[%s5777_s4 + $0x500] sm:$0xf]  ;;  %v3053_v20 = vor.u32 %v3725_v18, %v3052_v17  ;;  %v3757_v21 = vld [vmem:[%s5777_s4 + $0x50c] sm:$0xf0]  ;;  %v2910_v1 = vld [vmem:[%s5777_s4 + $0x2f0] sm:$0xf0] }
  0x5a   :  { %2010 = vmatpush.bf16.msrb.mxu3 %v3485_v5  ;;  %v3181_v22 = vor.u32 %v3757_v21, %v3180_v19  ;;  %v3324_v23 = vld [vmem:[%s5777_s4 + $0x620] sm:$0xf]  ;;  %v3793_v24 = vld [vmem:[%s5777_s4 + $0x62c] sm:$0xf0]  ;;  %v3719_v2 = vld [vmem:[%s5777_s4 + $0x3e4] sm:$0xf]  ;;  %v2769_v5 = vor.u32 %v3651_v56, %v2766_v57  ;;  %v2913_v12 = vor.u32 %v3687_v0, %v2910_v1 }
  0x5b   :  { %1972 = vmatpush.bf16.msrb.mxu0 %v3085_v62  ;;  %1985 = vmatpush.bf16.msrb.mxu1 %v3213_v63  ;;  %v3325_v25 = vor.u32 %v3793_v24, %v3324_v23  ;;  %v3452_v26 = vld [vmem:[%s5777_s4 + $0x720] sm:$0xf]  ;;  %v3825_v27 = vld [vmem:[%s5777_s4 + $0x72c] sm:$0xf0]  ;;  %v2641_v63 = vor.u32 %v3619_v53, %v2638_v54  ;;  %v3038_v6 = vld [vmem:[%s5777_s4 + $0x3f0] sm:$0xf0] }
  0x5c   :  { %v3453_v28 = vor.u32 %v3825_v27, %v3452_v26  ;;  %v3308_v29 = vld [vmem:[%s5777_s4 + $0x600] sm:$0xf]  ;;  %v3789_v30 = vld [vmem:[%s5777_s4 + $0x60c] sm:$0xf0]  ;;  %v3615_v7 = vld [vmem:[%s5777_s4 + $0xa4] sm:$0xf]  ;;  %v3041_v15 = vor.u32 %v3719_v2, %v3038_v6 }
  0x5d   :  { %1998 = vmatpush.bf16.msrb.mxu2 %v3341_v14  ;;  %v3309_v31 = vor.u32 %v3789_v30, %v3308_v29  ;;  %v3436_v32 = vld [vmem:[%s5777_s4 + $0x700] sm:$0xf]  ;;  %v3821_v33 = vld [vmem:[%s5777_s4 + $0x70c] sm:$0xf0]  ;;  %v3647_v58 = vld [vmem:[%s5777_s4 + $0x1a4] sm:$0xf] }
  0x5e   :  { %2011 = vmatpush.bf16.msrb.mxu3 %v3469_v16  ;;  %v3437_v34 = vor.u32 %v3821_v33, %v3436_v32  ;;  %v4535_v35 = vld [vmem:[%s5776_s3] sm:$0xff]  ;;  %v2894_v18 = vld [vmem:[%s5777_s4 + $0x2d0] sm:$0xf0] }
  0x5f   :  { %1973 = vmatpush.bf16.msrb.mxu0 %v3069_v8  ;;  %1986 = vmatpush.bf16.msrb.mxu1 %v3197_v10  ;;  %v69_v36 = vperm.slane %v4535_v35, 0  ;;  %v70_v37 = vperm.slane %v4535_v35, 1  ;;  %v71_v48 = vperm.slane %v4535_v35, 2  ;;  %v72_v51 = vperm.slane %v4535_v35, 3  ;;  %v2622_v8 = vld [vmem:[%s5777_s4 + $0xb0] sm:$0xf0] }
  0x60   :  { %v2750_v10 = vld [vmem:[%s5777_s4 + $0x1b0] sm:$0xf0]  ;;  %v73_v13 = vperm.slane %v4535_v35, 4  ;;  %v2625_v16 = vor.u32 %v3615_v7, %v2622_v8  ;;  %v3683_v17 = vld [vmem:[%s5777_s4 + $0x2c4] sm:$0xf]  ;;  %v76_v53 = vperm.slane %v4535_v35, 7 }
  0x61   :  { %1999 = vmatpush.bf16.msrb.mxu2 %v3325_v25  ;;  %v3715_v19 = vld [vmem:[%s5777_s4 + $0x3c4] sm:$0xf]  ;;  %v2753_v21 = vor.u32 %v3647_v58, %v2750_v10  ;;  %v2606_v24 = vld [vmem:[%s5777_s4 + $0x90] sm:$0xf0]  ;;  %v74_v25 = vperm.slane %v4535_v35, 5  ;;  %v2897_v29 = vor.u32 %v3683_v17, %v2894_v18 }
  0x62   :  { %2012 = vmatpush.bf16.msrb.mxu3 %v3453_v28  ;;  %v3611_v23 = vld [vmem:[%s5777_s4 + $0x84] sm:$0xf]  ;;  %v2734_v27 = vld [vmem:[%s5777_s4 + $0x190] sm:$0xf0] }
  0x63   :  { %1974 = vmatpush.bf16.msrb.mxu0 %v3053_v20  ;;  %1987 = vmatpush.bf16.msrb.mxu1 %v3181_v22  ;;  %v3022_v22 = vld [vmem:[%s5777_s4 + $0x3d0] sm:$0xf0]  ;;  %v3643_v26 = vld [vmem:[%s5777_s4 + $0x184] sm:$0xf]  ;;  %v2609_v33 = vor.u32 %v3611_v23, %v2606_v24 }
  0x64   :  { %v3025_v32 = vor.u32 %v3715_v19, %v3022_v22  ;;  %v3006_v41 = vld [vmem:[%s5777_s4 + $0x3b0] sm:$0xf0]  ;;  %v3607_v42 = vld [vmem:[%s5777_s4 + $0x64] sm:$0xf] }
  0x65   :  { %2000 = vmatpush.bf16.msrb.mxu2 %v3309_v31  ;;  %v2590_v44 = vld [vmem:[%s5777_s4 + $0x70] sm:$0xf0]  ;;  %v3639_v45 = vld [vmem:[%s5777_s4 + $0x164] sm:$0xf] }
  0x66   :  { %2013 = vmatpush.bf16.msrb.mxu3 %v3437_v34  ;;  %v3679_v34 = vld [vmem:[%s5777_s4 + $0x2a4] sm:$0xf]  ;;  %v2862_v56 = vld [vmem:[%s5777_s4 + $0x290] sm:$0xf0] }
  0x67   :  { %v3675_v54 = vld [vmem:[%s5777_s4 + $0x284] sm:$0xf]  ;;  %v2574_v0 = vld [vmem:[%s5777_s4 + $0x50] sm:$0xf0] }
  0x68   :  { %v3635_v1 = vld [vmem:[%s5777_s4 + $0x144] sm:$0xf]  ;;  %v2702_v2 = vld [vmem:[%s5777_s4 + $0x150] sm:$0xf0] }
  0x69   :  { %v3671_v8 = vld [vmem:[%s5777_s4 + $0x264] sm:$0xf]  ;;  %v2558_v17 = vld [vmem:[%s5777_s4 + $0x30] sm:$0xf0] }
  0x6a   :  { %v3703_v58 = vld [vmem:[%s5777_s4 + $0x364] sm:$0xf]  ;;  %v2686_v22 = vld [vmem:[%s5777_s4 + $0x130] sm:$0xf0] }
  0x93   :  { %v258_v38 = vpop.f32.mrf.mxu0  ;;  %v271_v40 = vpop.f32.mrf.mxu1 }
  0x94   :  { %v259_v39 = vadd.f32 %v258_v38, %v69_v36  ;;  %v272_v43 = vadd.f32 %v271_v40, %v70_v37  ;;  %v2878_v36 = vld [vmem:[%s5777_s4 + $0x2b0] sm:$0xf0]  ;;  %v3711_v40 = vld [vmem:[%s5777_s4 + $0x3a4] sm:$0xf] }
  0x96   :  { %v353_v46 = vmax.f32 %v259_v39, 0.0  ;;  %v354_v47 = vmax.f32 %v272_v43, 0.0  ;;  %v2737_v39 = vor.u32 %v3643_v26, %v2734_v27  ;;  %v3667_v27 = vld [vmem:[%s5777_s4 + $0x244] sm:$0xf] }
  0x98   :  { %v4552_v50 = vpack.c.bf16 %v353_v46, %v353_v46  ;;  %v4561_v55 = vpack.c.bf16 %v354_v47, %v354_v47  ;;  %v2718_v46 = vld [vmem:[%s5777_s4 + $0x170] sm:$0xf0] }
  0x9a   :  { %1923 = vmatmul.bf16.vlgmr.msra.gmra.mxu0 %v4552_v50  ;;  %1936 = vmatmul.bf16.vlgmr.msra.gmra.mxu1 %v4561_v55 }
  0x9b   :  { %v284_v59 = vpop.f32.mrf.mxu2  ;;  %v297_v61 = vpop.f32.mrf.mxu3  ;;  %2019 = vmatpush.bf16.msra.mxu0 %v2657_v49  ;;  %2032 = vmatpush.bf16.msra.mxu1 %v2785_v52  ;;  %v75_v49 = vperm.slane %v4535_v35, 6  ;;  %v3009_v52 = vor.u32 %v3711_v40, %v3006_v41  ;;  %v2990_v35 = vld [vmem:[%s5777_s4 + $0x390] sm:$0xf0] }
  0x9c   :  { %v285_v60 = vadd.f32 %v284_v59, %v71_v48  ;;  %v260_v62 = vpop.f32.mrf.mxu0  ;;  %v298_v3 = vadd.f32 %v297_v61, %v72_v51  ;;  %v273_v4 = vpop.f32.mrf.mxu1  ;;  %v2881_v48 = vor.u32 %v3679_v34, %v2878_v36  ;;  %v2593_v59 = vor.u32 %v3607_v42, %v2590_v44  ;;  %v3707_v61 = vld [vmem:[%s5777_s4 + $0x384] sm:$0xf]  ;;  %v2542_v36 = vld [vmem:[%s5777_s4 + $0x10] sm:$0xf0] }
  0x9d   :  { %v3603_v62 = vld [vmem:[%s5777_s4 + $0x44] sm:$0xf]  ;;  %v2865_v4 = vor.u32 %v3675_v54, %v2862_v56  ;;  %v2993_v7 = vor.u32 %v3707_v61, %v2990_v35  ;;  %v3166_v42 = vld [vmem:[%s5777_s4 + $0x4f0] sm:$0xf0] }
  0x9e   :  { %v355_v9 = vmax.f32 %v285_v60, 0.0  ;;  %v356_v11 = vmax.f32 %v298_v3, 0.0  ;;  %v2721_v60 = vor.u32 %v3639_v45, %v2718_v46  ;;  %v3595_v34 = vld [vmem:[%s5777_s4 + $0x4] sm:$0xf]  ;;  %v3294_v44 = vld [vmem:[%s5777_s4 + $0x5f0] sm:$0xf0] }
  0x9f   :  { %2020 = vmatpush.bf16.msra.mxu0 %v2641_v63  ;;  %2033 = vmatpush.bf16.msra.mxu1 %v2769_v5  ;;  %v3150_v61 = vld [vmem:[%s5777_s4 + $0x4d0] sm:$0xf0]  ;;  %v3779_v35 = vld [vmem:[%s5777_s4 + $0x5c4] sm:$0xf] }
  0xa0   :  { %v4596_v14 = vpack.c.bf16 %v355_v9, %v355_v9  ;;  %v4607_v20 = vpack.c.bf16 %v356_v11, %v356_v11  ;;  %v2846_v9 = vld [vmem:[%s5777_s4 + $0x270] sm:$0xf0] }
  0xa1   :  { %v2849_v24 = vor.u32 %v3671_v8, %v2846_v9  ;;  %v3847_v9 = vld [vmem:[%s5777_s4 + $0x7e4] sm:$0xf] }
  0xa2   :  { %1949 = vmatmul.bf16.vlgmr.msra.gmra.mxu2 %v4596_v14  ;;  %1962 = vmatmul.bf16.vlgmr.msra.gmra.mxu3 %v4607_v20 }
  0xa3   :  { %2045 = vmatpush.bf16.msra.mxu2 %v2913_v12  ;;  %v286_v28 = vpop.f32.mrf.mxu2  ;;  %2058 = vmatpush.bf16.msra.mxu3 %v3041_v15  ;;  %v299_v30 = vpop.f32.mrf.mxu3  ;;  %v2577_v12 = vor.u32 %v3603_v62, %v2574_v0  ;;  %v2974_v15 = vld [vmem:[%s5777_s4 + $0x370] sm:$0xf0] }
  0xa4   :  { %2021 = vmatpush.bf16.msra.mxu0 %v2625_v16  ;;  %v310_v31 = vpop.f32.mrf.mxu0  ;;  %2034 = vmatpush.bf16.msra.mxu1 %v2753_v21  ;;  %v323_v38 = vpop.f32.mrf.mxu1  ;;  %v3599_v16 = vld [vmem:[%s5777_s4 + $0x24] sm:$0xf]  ;;  %v2977_v26 = vor.u32 %v3703_v58, %v2974_v15  ;;  %v2830_v28 = vld [vmem:[%s5777_s4 + $0x250] sm:$0xf0] }
  0xa5   :  { %v311_v37 = vadd.f32 %v310_v31, %v73_v13  ;;  %v324_v43 = vadd.f32 %v323_v38, %v74_v25  ;;  %v2705_v13 = vor.u32 %v3635_v1, %v2702_v2  ;;  %v3631_v21 = vld [vmem:[%s5777_s4 + $0x124] sm:$0xf]  ;;  %v2561_v31 = vor.u32 %v3599_v16, %v2558_v17  ;;  %v2670_v38 = vld [vmem:[%s5777_s4 + $0x110] sm:$0xf0] }
  0xa6   :  { %v2833_v40 = vor.u32 %v3667_v27, %v2830_v28  ;;  %v3278_v62 = vld [vmem:[%s5777_s4 + $0x5d0] sm:$0xf0]  ;;  %v3659_v1 = vld [vmem:[%s5777_s4 + $0x204] sm:$0xf] }
  0xa7   :  { %v357_v47 = vmax.f32 %v311_v37, 0.0  ;;  %2046 = vmatpush.bf16.msra.mxu2 %v2897_v29  ;;  %v358_v51 = vmax.f32 %v324_v43, 0.0  ;;  %2059 = vmatpush.bf16.msra.mxu3 %v3025_v32  ;;  %v3699_v29 = vld [vmem:[%s5777_s4 + $0x344] sm:$0xf]  ;;  %v2689_v32 = vor.u32 %v3631_v21, %v2686_v22  ;;  %v2798_v2 = vld [vmem:[%s5777_s4 + $0x210] sm:$0xf0]  ;;  %v3281_v8 = vor.u32 %v3779_v35, %v3278_v62 }
  0xa8   :  { %2022 = vmatpush.bf16.msra.mxu0 %v2609_v33  ;;  %2035 = vmatpush.bf16.msra.mxu1 %v2737_v39  ;;  %v2958_v33 = vld [vmem:[%s5777_s4 + $0x350] sm:$0xf0]  ;;  %v3627_v37 = vld [vmem:[%s5777_s4 + $0x104] sm:$0xf] }
  0xa9   :  { %v4659_v57 = vpack.c.bf16 %v357_v47, %v357_v47  ;;  %v4670_v63 = vpack.c.bf16 %v358_v51, %v358_v51  ;;  %v3751_v39 = vld [vmem:[%s5777_s4 + $0x4e4] sm:$0xf]  ;;  %v2961_v45 = vor.u32 %v3699_v29, %v2958_v33  ;;  %v2673_v51 = vor.u32 %v3627_v37, %v2670_v38  ;;  %v3550_v58 = vld [vmem:[%s5777_s4 + $0x7f0] sm:$0xf0] }
  0xaa   :  { %v3783_v43 = vld [vmem:[%s5777_s4 + $0x5e4] sm:$0xf]  ;;  %v3169_v54 = vor.u32 %v3751_v39, %v3166_v42  ;;  %v3262_v15 = vld [vmem:[%s5777_s4 + $0x5b0] sm:$0xf0] }
  0xab   :  { %2047 = vmatpush.bf16.msra.mxu2 %v2881_v48  ;;  %v336_v3 = vpop.f32.mrf.mxu2  ;;  %1975 = vmatmul.bf16.vlgmr.msrb.gmra.mxu0 %v4659_v57  ;;  %v349_v6 = vpop.f32.mrf.mxu3  ;;  %v3663_v47 = vld [vmem:[%s5777_s4 + $0x224] sm:$0xf]  ;;  %v2814_v48 = vld [vmem:[%s5777_s4 + $0x230] sm:$0xf0]  ;;  %v3297_v56 = vor.u32 %v3783_v43, %v3294_v44 }
  0xac   :  { %2060 = vmatpush.bf16.msra.mxu3 %v3009_v52  ;;  %v337_v5 = vadd.f32 %v336_v3, %v75_v49  ;;  %1988 = vmatmul.bf16.vlgmr.msrb.gmra.mxu1 %v4670_v63  ;;  %v312_v10 = vpop.f32.mrf.mxu0  ;;  %v350_v11 = vadd.f32 %v349_v6, %v76_v53  ;;  %v325_v18 = vpop.f32.mrf.mxu1  ;;  %v2545_v49 = vor.u32 %v3595_v34, %v2542_v36  ;;  %v3695_v52 = vld [vmem:[%s5777_s4 + $0x324] sm:$0xf]  ;;  %v2942_v53 = vld [vmem:[%s5777_s4 + $0x330] sm:$0xf0] }
  0xad   :  { %2023 = vmatpush.bf16.msra.mxu0 %v2593_v59  ;;  %2036 = vmatpush.bf16.msra.mxu1 %v2721_v60  ;;  %v3747_v59 = vld [vmem:[%s5777_s4 + $0x4c4] sm:$0xf]  ;;  %v2817_v60 = vor.u32 %v3663_v47, %v2814_v48  ;;  %v2945_v0 = vor.u32 %v3695_v52, %v2942_v53  ;;  %v3422_v6 = vld [vmem:[%s5777_s4 + $0x6f0] sm:$0xf0]  ;;  %v3553_v18 = vor.u32 %v3847_v9, %v3550_v58 }
  0xae   :  { %v359_v19 = vmax.f32 %v337_v5, 0.0  ;;  %v360_v23 = vmax.f32 %v350_v11, 0.0  ;;  %v3691_v3 = vld [vmem:[%s5777_s4 + $0x304] sm:$0xf]  ;;  %v2801_v11 = vor.u32 %v3659_v1, %v2798_v2  ;;  %v3406_v21 = vld [vmem:[%s5777_s4 + $0x6d0] sm:$0xf0] }
  0xaf   :  { %2048 = vmatpush.bf16.msra.mxu2 %v2865_v4  ;;  %v2926_v4 = vld [vmem:[%s5777_s4 + $0x310] sm:$0xf0]  ;;  %v3815_v5 = vld [vmem:[%s5777_s4 + $0x6e4] sm:$0xf] }
  0xb0   :  { %v4707_v25 = vpack.c.bf16 %v359_v19, %v359_v19  ;;  %2061 = vmatpush.bf16.msra.mxu3 %v2993_v7  ;;  %v4718_v30 = vpack.c.bf16 %v360_v23, %v360_v23  ;;  %v3153_v7 = vor.u32 %v3747_v59, %v3150_v61  ;;  %v3743_v10 = vld [vmem:[%s5777_s4 + $0x4a4] sm:$0xf]  ;;  %v2929_v16 = vor.u32 %v3691_v3, %v2926_v4  ;;  %v3118_v28 = vld [vmem:[%s5777_s4 + $0x490] sm:$0xf0] }
  0xb1   :  { %2024 = vmatpush.bf16.msra.mxu0 %v2577_v12  ;;  %2037 = vmatpush.bf16.msra.mxu1 %v2705_v13  ;;  %v3134_v12 = vld [vmem:[%s5777_s4 + $0x4b0] sm:$0xf0]  ;;  %v3775_v13 = vld [vmem:[%s5777_s4 + $0x5a4] sm:$0xf]  ;;  %v3425_v17 = vor.u32 %v3815_v5, %v3422_v6 }
  0xb2   :  { %2001 = vmatmul.bf16.vlgmr.msrb.gmra.mxu2 %v4707_v25  ;;  %2014 = vmatmul.bf16.vlgmr.msrb.gmra.mxu3 %v4718_v30  ;;  %v3811_v19 = vld [vmem:[%s5777_s4 + $0x6c4] sm:$0xf]  ;;  %v3137_v22 = vor.u32 %v3743_v10, %v3134_v12  ;;  %v3265_v23 = vor.u32 %v3775_v13, %v3262_v15  ;;  %v3390_v36 = vld [vmem:[%s5777_s4 + $0x6b0] sm:$0xf0] }
  0xb3   :  { %2049 = vmatpush.bf16.msra.mxu2 %v2849_v24  ;;  %v338_v41 = vpop.f32.mrf.mxu2  ;;  %v351_v46 = vpop.f32.mrf.mxu3  ;;  %v3843_v24 = vld [vmem:[%s5777_s4 + $0x7c4] sm:$0xf]  ;;  %v3102_v42 = vld [vmem:[%s5777_s4 + $0x470] sm:$0xf0] }
  0xb4   :  { %2062 = vmatpush.bf16.msra.mxu3 %v2977_v26  ;;  %v3534_v26 = vld [vmem:[%s5777_s4 + $0x7d0] sm:$0xf0]  ;;  %v3739_v27 = vld [vmem:[%s5777_s4 + $0x484] sm:$0xf] }
  0xb5   :  { %2025 = vmatpush.bf16.msra.mxu0 %v2561_v31  ;;  %2038 = vmatpush.bf16.msra.mxu1 %v2689_v32  ;;  %v3771_v29 = vld [vmem:[%s5777_s4 + $0x584] sm:$0xf]  ;;  %v3246_v31 = vld [vmem:[%s5777_s4 + $0x590] sm:$0xf0]  ;;  %v3409_v32 = vor.u32 %v3811_v19, %v3406_v21  ;;  %v3537_v33 = vor.u32 %v3843_v24, %v3534_v26  ;;  %v3121_v37 = vor.u32 %v3739_v27, %v3118_v28  ;;  %v3626_v24 = vld [vmem:[%s5777_s4 + $0xf4] sm:$0xf0] }
  0xb6   :  { %v3807_v34 = vld [vmem:[%s5777_s4 + $0x6a4] sm:$0xf]  ;;  %v3249_v38 = vor.u32 %v3771_v29, %v3246_v31  ;;  %v3230_v44 = vld [vmem:[%s5777_s4 + $0x570] sm:$0xf0]  ;;  %v2788_v26 = vld [vmem:[%s5777_s4 + $0x1e8] sm:$0xf] }
  0xb7   :  { %2050 = vmatpush.bf16.msra.mxu2 %v2833_v40  ;;  %v3839_v39 = vld [vmem:[%s5777_s4 + $0x7a4] sm:$0xf]  ;;  %v3518_v40 = vld [vmem:[%s5777_s4 + $0x7b0] sm:$0xf0]  ;;  %v3658_v27 = vld [vmem:[%s5777_s4 + $0x1f4] sm:$0xf0] }
  0xb8   :  { %2063 = vmatpush.bf16.msra.mxu3 %v2961_v45  ;;  %v3735_v41 = vld [vmem:[%s5777_s4 + $0x464] sm:$0xf]  ;;  %v3393_v45 = vor.u32 %v3807_v34, %v3390_v36  ;;  %v3521_v46 = vor.u32 %v3839_v39, %v3518_v40  ;;  %v3374_v48 = vld [vmem:[%s5777_s4 + $0x690] sm:$0xf0]  ;;  %v2644_v39 = vld [vmem:[%s5777_s4 + $0xc8] sm:$0xf] }
  0xb9   :  { %2026 = vmatpush.bf16.msra.mxu0 %v2545_v49  ;;  %2039 = vmatpush.bf16.msra.mxu1 %v2673_v51  ;;  %v3767_v43 = vld [vmem:[%s5777_s4 + $0x564] sm:$0xf]  ;;  %v3105_v49 = vor.u32 %v3735_v41, %v3102_v42  ;;  %v3502_v53 = vld [vmem:[%s5777_s4 + $0x790] sm:$0xf0]  ;;  %v3622_v41 = vld [vmem:[%s5777_s4 + $0xd4] sm:$0xf0] }
  0xba   :  { %v3803_v47 = vld [vmem:[%s5777_s4 + $0x684] sm:$0xf]  ;;  %v3233_v51 = vor.u32 %v3767_v43, %v3230_v44  ;;  %v3486_v4 = vld [vmem:[%s5777_s4 + $0x770] sm:$0xf0]  ;;  %v2772_v42 = vld [vmem:[%s5777_s4 + $0x1c8] sm:$0xf] }
  0xbb   :  { %2051 = vmatpush.bf16.msra.mxu2 %v2817_v60  ;;  %v3835_v52 = vld [vmem:[%s5777_s4 + $0x784] sm:$0xf]  ;;  %v3214_v60 = vld [vmem:[%s5777_s4 + $0x550] sm:$0xf0]  ;;  %v3377_v61 = vor.u32 %v3803_v47, %v3374_v48  ;;  %v3654_v43 = vld [vmem:[%s5777_s4 + $0x1d4] sm:$0xf0] }
  0xbc   :  { %2064 = vmatpush.bf16.msra.mxu3 %v2945_v0  ;;  %2027 = vmatmul.bf16.vlgmr.msra.gmra.mxu0 %v4552_v50  ;;  %v3763_v59 = vld [vmem:[%s5777_s4 + $0x544] sm:$0xf]  ;;  %v3505_v35 = vor.u32 %v3835_v52, %v3502_v53  ;;  %v3358_v0 = vld [vmem:[%s5777_s4 + $0x670] sm:$0xf0]  ;;  %v2645_v52 = vor.u32 %v3622_v41, %v2644_v39  ;;  %v2773_v53 = vor.u32 %v3654_v43, %v2772_v42  ;;  %v3638_v41 = vld [vmem:[%s5777_s4 + $0x154] sm:$0xf0] }
  0xbd   :  { %2071 = vmatpush.bf16.msrb.mxu0 %v3169_v54  ;;  %2084 = vmatpush.bf16.msrb.mxu1 %v3297_v56  ;;  %v3731_v54 = vld [vmem:[%s5777_s4 + $0x444] sm:$0xf]  ;;  %v3086_v56 = vld [vmem:[%s5777_s4 + $0x450] sm:$0xf0]  ;;  %v3217_v2 = vor.u32 %v3763_v59, %v3214_v60  ;;  %v2628_v60 = vld [vmem:[%s5777_s4 + $0xa8] sm:$0xf] }
  0xbe   :  { %2040 = vmatmul.bf16.vlgmr.msra.gmra.mxu1 %v4561_v55  ;;  %v3799_v62 = vld [vmem:[%s5777_s4 + $0x664] sm:$0xf]  ;;  %v3089_v1 = vor.u32 %v3731_v54, %v3086_v56  ;;  %v3070_v6 = vld [vmem:[%s5777_s4 + $0x430] sm:$0xf0]  ;;  %v3044_v54 = vld [vmem:[%s5777_s4 + $0x3e8] sm:$0xf] }
  0xbf   :  { %2052 = vmatpush.bf16.msra.mxu2 %v2801_v11  ;;  %v3831_v3 = vld [vmem:[%s5777_s4 + $0x764] sm:$0xf]  ;;  %v3361_v9 = vor.u32 %v3799_v62, %v3358_v0  ;;  %v3342_v11 = vld [vmem:[%s5777_s4 + $0x650] sm:$0xf0]  ;;  %v3722_v56 = vld [vmem:[%s5777_s4 + $0x3f4] sm:$0xf0] }
  0xc0   :  { %2065 = vmatpush.bf16.msra.mxu3 %v2929_v16  ;;  %v3727_v5 = vld [vmem:[%s5777_s4 + $0x424] sm:$0xf]  ;;  %v3489_v58 = vor.u32 %v3831_v3, %v3486_v4  ;;  %v3470_v16 = vld [vmem:[%s5777_s4 + $0x750] sm:$0xf0]  ;;  %v2756_v0 = vld [vmem:[%s5777_s4 + $0x1a8] sm:$0xf] }
  0xc1   :  { %2072 = vmatpush.bf16.msrb.mxu0 %v3153_v7  ;;  %2085 = vmatpush.bf16.msrb.mxu1 %v3281_v8  ;;  %v3759_v7 = vld [vmem:[%s5777_s4 + $0x524] sm:$0xf]  ;;  %v3198_v8 = vld [vmem:[%s5777_s4 + $0x530] sm:$0xf0]  ;;  %v3073_v13 = vor.u32 %v3727_v5, %v3070_v6  ;;  %v2900_v3 = vld [vmem:[%s5777_s4 + $0x2c8] sm:$0xf] }
  0xc2   :  { %2053 = vmatmul.bf16.vlgmr.msra.gmra.mxu2 %v4596_v14  ;;  %v3795_v10 = vld [vmem:[%s5777_s4 + $0x644] sm:$0xf]  ;;  %v3201_v15 = vor.u32 %v3759_v7, %v3198_v8  ;;  %v3182_v21 = vld [vmem:[%s5777_s4 + $0x510] sm:$0xf0]  ;;  %v3686_v4 = vld [vmem:[%s5777_s4 + $0x2d4] sm:$0xf0] }
  0xc3   :  { %2097 = vmatpush.bf16.msrb.mxu2 %v3425_v17  ;;  %2066 = vmatmul.bf16.vlgmr.msra.gmra.mxu3 %v4607_v20  ;;  %v3827_v12 = vld [vmem:[%s5777_s4 + $0x744] sm:$0xf]  ;;  %v3326_v31 = vld [vmem:[%s5777_s4 + $0x630] sm:$0xf0]  ;;  %v3028_v6 = vld [vmem:[%s5777_s4 + $0x3c8] sm:$0xf] }
  0xc4   :  { %2110 = vmatpush.bf16.msrb.mxu3 %v3553_v18  ;;  %v3723_v17 = vld [vmem:[%s5777_s4 + $0x404] sm:$0xf]  ;;  %v3054_v18 = vld [vmem:[%s5777_s4 + $0x410] sm:$0xf0]  ;;  %v3473_v28 = vor.u32 %v3827_v12, %v3470_v16  ;;  %v3718_v7 = vld [vmem:[%s5777_s4 + $0x3d4] sm:$0xf0] }
  0xc5   :  { %2073 = vmatpush.bf16.msrb.mxu0 %v3137_v22  ;;  %2086 = vmatpush.bf16.msrb.mxu1 %v3265_v23  ;;  %v3755_v19 = vld [vmem:[%s5777_s4 + $0x504] sm:$0xf]  ;;  %v2660_v22 = vld [vmem:[%s5777_s4 + $0xe8] sm:$0xf]  ;;  %v3345_v23 = vor.u32 %v3795_v10, %v3342_v11  ;;  %v3454_v36 = vld [vmem:[%s5777_s4 + $0x730] sm:$0xf0]  ;;  %v2901_v10 = vor.u32 %v3686_v4, %v2900_v3 }
  0xc6   :  { %v3791_v29 = vld [vmem:[%s5777_s4 + $0x624] sm:$0xf]  ;;  %v3438_v48 = vld [vmem:[%s5777_s4 + $0x710] sm:$0xf0]  ;;  %v2740_v11 = vld [vmem:[%s5777_s4 + $0x188] sm:$0xf] }
  0xc7   :  { %2098 = vmatpush.bf16.msrb.mxu2 %v3409_v32  ;;  %v3057_v32 = vor.u32 %v3723_v17, %v3054_v18  ;;  %v3823_v34 = vld [vmem:[%s5777_s4 + $0x724] sm:$0xf]  ;;  %v3329_v40 = vor.u32 %v3791_v29, %v3326_v31  ;;  %v3646_v12 = vld [vmem:[%s5777_s4 + $0x194] sm:$0xf0]  ;;  %v3012_v18 = vld [vmem:[%s5777_s4 + $0x3a8] sm:$0xf] }
  0xc8   :  { %2111 = vmatpush.bf16.msrb.mxu3 %v3537_v33  ;;  %v3185_v33 = vor.u32 %v3755_v19, %v3182_v21  ;;  %v3457_v44 = vor.u32 %v3823_v34, %v3454_v36  ;;  %v3819_v47 = vld [vmem:[%s5777_s4 + $0x704] sm:$0xf]  ;;  %v3682_v16 = vld [vmem:[%s5777_s4 + $0x2b4] sm:$0xf0]  ;;  %v2741_v21 = vor.u32 %v3646_v12, %v2740_v11  ;;  %v2868_v29 = vld [vmem:[%s5777_s4 + $0x288] sm:$0xf] }
  0xc9   :  { %2074 = vmatpush.bf16.msrb.mxu0 %v3121_v37  ;;  %2087 = vmatpush.bf16.msrb.mxu1 %v3249_v38  ;;  %v2661_v37 = vor.u32 %v3626_v24, %v2660_v22  ;;  %v2789_v38 = vor.u32 %v3658_v27, %v2788_v26  ;;  %v3714_v19 = vld [vmem:[%s5777_s4 + $0x3b4] sm:$0xf0]  ;;  %v2596_v22 = vld [vmem:[%s5777_s4 + $0x68] sm:$0xf] }
  0xca   :  { %v2724_v26 = vld [vmem:[%s5777_s4 + $0x168] sm:$0xf]  ;;  %v3642_v27 = vld [vmem:[%s5777_s4 + $0x174] sm:$0xf0] }
  0xcb   :  { %2099 = vmatpush.bf16.msrb.mxu2 %v3393_v45  ;;  %v3787_v45 = vld [vmem:[%s5777_s4 + $0x604] sm:$0xf]  ;;  %v3678_v31 = vld [vmem:[%s5777_s4 + $0x294] sm:$0xf0]  ;;  %v2725_v36 = vor.u32 %v3642_v27, %v2724_v26  ;;  %v2852_v43 = vld [vmem:[%s5777_s4 + $0x268] sm:$0xf] }
  0xcc   :  { %2112 = vmatpush.bf16.msrb.mxu3 %v3521_v46  ;;  %v3310_v46 = vld [vmem:[%s5777_s4 + $0x610] sm:$0xf0]  ;;  %v3710_v34 = vld [vmem:[%s5777_s4 + $0x394] sm:$0xf0]  ;;  %v2869_v39 = vor.u32 %v3678_v31, %v2868_v29  ;;  %v2676_v3 = vld [vmem:[%s5777_s4 + $0x108] sm:$0xf] }
  0xcd   :  { %2075 = vmatpush.bf16.msrb.mxu0 %v3105_v49  ;;  %2088 = vmatpush.bf16.msrb.mxu1 %v3233_v51  ;;  %v2916_v49 = vld [vmem:[%s5777_s4 + $0x2e8] sm:$0xf]  ;;  %v3690_v51 = vld [vmem:[%s5777_s4 + $0x2f4] sm:$0xf0]  ;;  %v3313_v59 = vor.u32 %v3787_v45, %v3310_v46 }
  0xce   :  { %v2917_v62 = vor.u32 %v3690_v51, %v2916_v49  ;;  %v2980_v46 = vld [vmem:[%s5777_s4 + $0x368] sm:$0xf]  ;;  %v3602_v51 = vld [vmem:[%s5777_s4 + $0x34] sm:$0xf0] }
  0xcf   :  { %2100 = vmatpush.bf16.msrb.mxu2 %v3377_v61  ;;  %v3618_v61 = vld [vmem:[%s5777_s4 + $0xb4] sm:$0xf0]  ;;  %v2564_v49 = vld [vmem:[%s5777_s4 + $0x28] sm:$0xf] }
  0xd0   :  { %2113 = vmatpush.bf16.msrb.mxu3 %v3505_v35  ;;  %v3441_v35 = vor.u32 %v3819_v47, %v3438_v48  ;;  %v2629_v5 = vor.u32 %v3618_v61, %v2628_v60  ;;  %v3706_v47 = vld [vmem:[%s5777_s4 + $0x374] sm:$0xf0]  ;;  %v2565_v61 = vor.u32 %v3602_v51, %v2564_v49  ;;  %v2804_v27 = vld [vmem:[%s5777_s4 + $0x208] sm:$0xf] }
  0xd1   :  { %2076 = vmatpush.bf16.msrb.mxu0 %v3089_v1  ;;  %2089 = vmatpush.bf16.msrb.mxu1 %v3217_v2  ;;  %v3650_v1 = vld [vmem:[%s5777_s4 + $0x1b4] sm:$0xf0]  ;;  %v3045_v2 = vor.u32 %v3722_v56, %v3044_v54  ;;  %v2981_v56 = vor.u32 %v3706_v47, %v2980_v46  ;;  %v2932_v29 = vld [vmem:[%s5777_s4 + $0x308] sm:$0xf] }
  0xd2   :  { %v2757_v8 = vor.u32 %v3650_v1, %v2756_v0  ;;  %v3634_v54 = vld [vmem:[%s5777_s4 + $0x134] sm:$0xf0]  ;;  %v2548_v0 = vld [vmem:[%s5777_s4 + $0x8] sm:$0xf] }
  0xd3   :  { %2101 = vmatpush.bf16.msrb.mxu2 %v3361_v9  ;;  %v2612_v9 = vld [vmem:[%s5777_s4 + $0x88] sm:$0xf]  ;;  %v3670_v60 = vld [vmem:[%s5777_s4 + $0x254] sm:$0xf0] }
  0xd4   :  { %2114 = vmatpush.bf16.msrb.mxu3 %v3489_v58  ;;  %v3614_v58 = vld [vmem:[%s5777_s4 + $0x94] sm:$0xf0]  ;;  %v3412_v47 = vld [vmem:[%s5777_s4 + $0x6c8] sm:$0xf] }
  0xd5   :  { %2077 = vmatpush.bf16.msrb.mxu0 %v3073_v13  ;;  %2090 = vmatpush.bf16.msrb.mxu1 %v3201_v15  ;;  %v3029_v13 = vor.u32 %v3718_v7, %v3028_v6  ;;  %v2884_v15 = vld [vmem:[%s5777_s4 + $0x2a8] sm:$0xf]  ;;  %v2613_v17 = vor.u32 %v3614_v58, %v2612_v9  ;;  %v3630_v4 = vld [vmem:[%s5777_s4 + $0x114] sm:$0xf0] }
  0xd6   :  { %v2885_v24 = vor.u32 %v3682_v16, %v2884_v15  ;;  %v3172_v6 = vld [vmem:[%s5777_s4 + $0x4e8] sm:$0xf]  ;;  %v3754_v7 = vld [vmem:[%s5777_s4 + $0x4f4] sm:$0xf0]  ;;  %v2677_v16 = vor.u32 %v3630_v4, %v2676_v3 }
  0xd7   :  { %2102 = vmatpush.bf16.msrb.mxu2 %v3345_v23  ;;  %v3610_v23 = vld [vmem:[%s5777_s4 + $0x74] sm:$0xf0]  ;;  %v3540_v51 = vld [vmem:[%s5777_s4 + $0x7c8] sm:$0xf] }
  0xd8   :  { %2115 = vmatpush.bf16.msrb.mxu3 %v3473_v28  ;;  %v3013_v28 = vor.u32 %v3714_v19, %v3012_v18  ;;  %v3786_v58 = vld [vmem:[%s5777_s4 + $0x5f4] sm:$0xf0]  ;;  %v3156_v18 = vld [vmem:[%s5777_s4 + $0x4c8] sm:$0xf] }
  0xd9   :  { %2078 = vmatpush.bf16.msrb.mxu0 %v3057_v32  ;;  %2091 = vmatpush.bf16.msrb.mxu1 %v3185_v33  ;;  %v2597_v32 = vor.u32 %v3610_v23, %v2596_v22  ;;  %v2996_v33 = vld [vmem:[%s5777_s4 + $0x388] sm:$0xf]  ;;  %v3666_v11 = vld [vmem:[%s5777_s4 + $0x234] sm:$0xf0] }
  0xda   :  { %v2997_v42 = vor.u32 %v3710_v34, %v2996_v33  ;;  %v3698_v15 = vld [vmem:[%s5777_s4 + $0x334] sm:$0xf0]  ;;  %v3284_v23 = vld [vmem:[%s5777_s4 + $0x5c8] sm:$0xf] }
  0xdb   :  { %2103 = vmatpush.bf16.msrb.mxu2 %v3329_v40  ;;  %v2708_v40 = vld [vmem:[%s5777_s4 + $0x148] sm:$0xf]  ;;  %v3750_v22 = vld [vmem:[%s5777_s4 + $0x4d4] sm:$0xf0] }
  0xdc   :  { %2116 = vmatpush.bf16.msrb.mxu3 %v3457_v44  ;;  %2079 = vmatmul.bf16.vlgmr.msrb.gmra.mxu0 %v4659_v57  ;;  %v3674_v44 = vld [vmem:[%s5777_s4 + $0x274] sm:$0xf0]  ;;  %v2709_v48 = vor.u32 %v3638_v41, %v2708_v40  ;;  %v3157_v34 = vor.u32 %v3750_v22, %v3156_v18  ;;  %v3140_v40 = vld [vmem:[%s5777_s4 + $0x4a8] sm:$0xf] }
  0xdd   :  { %2123 = vmatpush.bf16.msra.mxu0 %v2661_v37  ;;  %2136 = vmatpush.bf16.msra.mxu1 %v2789_v38  ;;  %v2580_v37 = vld [vmem:[%s5777_s4 + $0x48] sm:$0xf]  ;;  %v3606_v38 = vld [vmem:[%s5777_s4 + $0x54] sm:$0xf0] }
  0xde   :  { %2092 = vmatmul.bf16.vlgmr.msrb.gmra.mxu1 %v4670_v63  ;;  %v2581_v45 = vor.u32 %v3606_v38, %v2580_v37  ;;  %v3694_v31 = vld [vmem:[%s5777_s4 + $0x314] sm:$0xf0] }
  0xdf   :  { %2104 = vmatpush.bf16.msrb.mxu2 %v3313_v59  ;;  %v2836_v59 = vld [vmem:[%s5777_s4 + $0x248] sm:$0xf]  ;;  %v3818_v33 = vld [vmem:[%s5777_s4 + $0x6f4] sm:$0xf0] }
  0xe0   :  { %2117 = vmatpush.bf16.msrb.mxu3 %v3441_v35  ;;  %v2964_v35 = vld [vmem:[%s5777_s4 + $0x348] sm:$0xf]  ;;  %v3850_v37 = vld [vmem:[%s5777_s4 + $0x7f4] sm:$0xf0] }
  0xe1   :  { %2124 = vmatpush.bf16.msra.mxu0 %v2645_v52  ;;  %2137 = vmatpush.bf16.msra.mxu1 %v2773_v53  ;;  %v2853_v52 = vor.u32 %v3674_v44, %v2852_v43  ;;  %v2692_v53 = vld [vmem:[%s5777_s4 + $0x128] sm:$0xf]  ;;  %v3746_v41 = vld [vmem:[%s5777_s4 + $0x4b4] sm:$0xf0] }
  0xe2   :  { %2105 = vmatmul.bf16.vlgmr.msrb.gmra.mxu2 %v4707_v25  ;;  %v2693_v1 = vor.u32 %v3634_v54, %v2692_v53  ;;  %v3268_v44 = vld [vmem:[%s5777_s4 + $0x5a8] sm:$0xf]  ;;  %v3141_v49 = vor.u32 %v3746_v41, %v3140_v40  ;;  %v3842_v3 = vld [vmem:[%s5777_s4 + $0x7b4] sm:$0xf0] }
  0xe3   :  { %2149 = vmatpush.bf16.msra.mxu2 %v2917_v62  ;;  %2118 = vmatmul.bf16.vlgmr.msrb.gmra.mxu3 %v4718_v30  ;;  %v3702_v62 = vld [vmem:[%s5777_s4 + $0x354] sm:$0xf0]  ;;  %v3124_v54 = vld [vmem:[%s5777_s4 + $0x488] sm:$0xf] }
  0xe4   :  { %2162 = vmatpush.bf16.msra.mxu3 %v3045_v2  ;;  %v3598_v2 = vld [vmem:[%s5777_s4 + $0x14] sm:$0xf0]  ;;  %v2965_v9 = vor.u32 %v3702_v62, %v2964_v35  ;;  %v3396_v62 = vld [vmem:[%s5777_s4 + $0x6a8] sm:$0xf] }
  0xe5   :  { %2125 = vmatpush.bf16.msra.mxu0 %v2629_v5  ;;  %2138 = vmatpush.bf16.msra.mxu1 %v2757_v8  ;;  %v2837_v5 = vor.u32 %v3670_v60, %v2836_v59  ;;  %v3300_v8 = vld [vmem:[%s5777_s4 + $0x5e8] sm:$0xf]  ;;  %v2549_v12 = vor.u32 %v3598_v2, %v2548_v0  ;;  %v3810_v0 = vld [vmem:[%s5777_s4 + $0x6b4] sm:$0xf0] }
  0xe6   :  { %v3301_v19 = vor.u32 %v3786_v58, %v3300_v8  ;;  %v3252_v60 = vld [vmem:[%s5777_s4 + $0x588] sm:$0xf]  ;;  %v3734_v18 = vld [vmem:[%s5777_s4 + $0x454] sm:$0xf0] }
  0xe7   :  { %2150 = vmatpush.bf16.msra.mxu2 %v2901_v10  ;;  %v2820_v10 = vld [vmem:[%s5777_s4 + $0x228] sm:$0xf]  ;;  %v3766_v22 = vld [vmem:[%s5777_s4 + $0x554] sm:$0xf0] }
  0xe8   :  { %2163 = vmatpush.bf16.msra.mxu3 %v3029_v13  ;;  %v2948_v13 = vld [vmem:[%s5777_s4 + $0x328] sm:$0xf]  ;;  %v3798_v40 = vld [vmem:[%s5777_s4 + $0x654] sm:$0xf0] }
  0xe9   :  { %2126 = vmatpush.bf16.msra.mxu0 %v2613_v17  ;;  %2139 = vmatpush.bf16.msra.mxu1 %v2741_v21  ;;  %v3173_v17 = vor.u32 %v3754_v7, %v3172_v6  ;;  %v2821_v21 = vor.u32 %v3666_v11, %v2820_v10  ;;  %v2949_v26 = vor.u32 %v3698_v15, %v2948_v13  ;;  %v3524_v2 = vld [vmem:[%s5777_s4 + $0x7a8] sm:$0xf]  ;;  %v3738_v6 = vld [vmem:[%s5777_s4 + $0x474] sm:$0xf0] }
  0xea   :  { %v3397_v7 = vor.u32 %v3810_v0, %v3396_v62  ;;  %v3236_v8 = vld [vmem:[%s5777_s4 + $0x568] sm:$0xf]  ;;  %v3525_v58 = vor.u32 %v3842_v3, %v3524_v2  ;;  %v3806_v11 = vld [vmem:[%s5777_s4 + $0x694] sm:$0xf0]  ;;  %v3620_v2 = vld [vmem:[%s5777_s4 + $0xcc] sm:$0xf] }
  0xeb   :  { %2151 = vmatpush.bf16.msra.mxu2 %v2885_v24  ;;  %v3782_v24 = vld [vmem:[%s5777_s4 + $0x5d4] sm:$0xf0]  ;;  %v3380_v10 = vld [vmem:[%s5777_s4 + $0x688] sm:$0xf] }
  0xec   :  { %2164 = vmatpush.bf16.msra.mxu3 %v3013_v28  ;;  %v3662_v28 = vld [vmem:[%s5777_s4 + $0x214] sm:$0xf0]  ;;  %v3285_v38 = vor.u32 %v3782_v24, %v3284_v23  ;;  %v3508_v13 = vld [vmem:[%s5777_s4 + $0x788] sm:$0xf] }
  0xed   :  { %2127 = vmatpush.bf16.msra.mxu0 %v2597_v32  ;;  %2140 = vmatpush.bf16.msra.mxu1 %v2725_v36  ;;  %v3428_v32 = vld [vmem:[%s5777_s4 + $0x6e8] sm:$0xf]  ;;  %v3838_v15 = vld [vmem:[%s5777_s4 + $0x794] sm:$0xf0] }
  0xee   :  { %v3556_v36 = vld [vmem:[%s5777_s4 + $0x7e8] sm:$0xf]  ;;  %v3429_v43 = vor.u32 %v3818_v33, %v3428_v32  ;;  %v3509_v23 = vor.u32 %v3838_v15, %v3508_v13  ;;  %v3730_v33 = vld [vmem:[%s5777_s4 + $0x434] sm:$0xf0]  ;;  %v2918_v13 = vld [vmem:[%s5777_s4 + $0x2f8] sm:$0xf0] }
  0xef   :  { %2152 = vmatpush.bf16.msra.mxu2 %v2869_v39  ;;  %v2805_v39 = vor.u32 %v3662_v28, %v2804_v27  ;;  %v3557_v46 = vor.u32 %v3850_v37, %v3556_v36  ;;  %v3364_v24 = vld [vmem:[%s5777_s4 + $0x668] sm:$0xf]  ;;  %v3762_v37 = vld [vmem:[%s5777_s4 + $0x534] sm:$0xf0] }
  0xf0   :  { %2165 = vmatpush.bf16.msra.mxu3 %v2997_v42  ;;  %v2933_v42 = vor.u32 %v3694_v31, %v2932_v29  ;;  %v3492_v28 = vld [vmem:[%s5777_s4 + $0x768] sm:$0xf]  ;;  %v3834_v29 = vld [vmem:[%s5777_s4 + $0x774] sm:$0xf0] }
  0xf1   :  { %2128 = vmatpush.bf16.msra.mxu0 %v2581_v45  ;;  %2141 = vmatpush.bf16.msra.mxu1 %v2709_v48  ;;  %v3778_v45 = vld [vmem:[%s5777_s4 + $0x5b4] sm:$0xf0]  ;;  %v3076_v32 = vld [vmem:[%s5777_s4 + $0x428] sm:$0xf] }
  0xf2   :  { %v3814_v48 = vld [vmem:[%s5777_s4 + $0x6d4] sm:$0xf0]  ;;  %v3269_v53 = vor.u32 %v3778_v45, %v3268_v44  ;;  %v3204_v36 = vld [vmem:[%s5777_s4 + $0x528] sm:$0xf]  ;;  %v3077_v41 = vor.u32 %v3730_v33, %v3076_v32  ;;  %v2902_v32 = vld [vmem:[%s5777_s4 + $0x2d8] sm:$0xf0] }
  0xf3   :  { %2153 = vmatpush.bf16.msra.mxu2 %v2853_v52  ;;  %v3846_v52 = vld [vmem:[%s5777_s4 + $0x7d4] sm:$0xf0]  ;;  %v3413_v59 = vor.u32 %v3814_v48, %v3412_v47  ;;  %v3060_v44 = vld [vmem:[%s5777_s4 + $0x408] sm:$0xf]  ;;  %v3205_v45 = vor.u32 %v3762_v37, %v3204_v36  ;;  %v3716_v36 = vld [vmem:[%s5777_s4 + $0x3cc] sm:$0xf] }
  0xf4   :  { %2166 = vmatpush.bf16.msra.mxu3 %v2981_v56  ;;  %v3742_v56 = vld [vmem:[%s5777_s4 + $0x494] sm:$0xf0]  ;;  %v3541_v35 = vor.u32 %v3846_v52, %v3540_v51  ;;  %v3188_v47 = vld [vmem:[%s5777_s4 + $0x508] sm:$0xf]  ;;  %v3624_v51 = vld [vmem:[%s5777_s4 + $0xec] sm:$0xf] }
  0xf5   :  { %2129 = vmatpush.bf16.msra.mxu0 %v2565_v61  ;;  %2142 = vmatpush.bf16.msra.mxu1 %v2693_v1  ;;  %v3774_v61 = vld [vmem:[%s5777_s4 + $0x594] sm:$0xf0]  ;;  %v3125_v1 = vor.u32 %v3742_v56, %v3124_v54  ;;  %v2662_v52 = vld [vmem:[%s5777_s4 + $0xf8] sm:$0xf0] }
  0xf6   :  { %v3253_v4 = vor.u32 %v3774_v61, %v3252_v60  ;;  %v3758_v48 = vld [vmem:[%s5777_s4 + $0x514] sm:$0xf0]  ;;  %v2790_v56 = vld [vmem:[%s5777_s4 + $0x1f8] sm:$0xf0] }
  0xf7   :  { %2154 = vmatpush.bf16.msra.mxu2 %v2837_v5  ;;  %v3108_v5 = vld [vmem:[%s5777_s4 + $0x468] sm:$0xf]  ;;  %v3794_v60 = vld [vmem:[%s5777_s4 + $0x634] sm:$0xf0]  ;;  %v3189_v0 = vor.u32 %v3758_v48, %v3188_v47  ;;  %v3030_v37 = vld [vmem:[%s5777_s4 + $0x3d8] sm:$0xf0] }
  0xf8   :  { %2167 = vmatpush.bf16.msra.mxu3 %v2965_v9  ;;  %v3770_v9 = vld [vmem:[%s5777_s4 + $0x574] sm:$0xf0]  ;;  %v2886_v47 = vld [vmem:[%s5777_s4 + $0x2b8] sm:$0xf0] }
  0xf9   :  { %2130 = vmatpush.bf16.msra.mxu0 %v2549_v12  ;;  %2143 = vmatpush.bf16.msra.mxu1 %v2677_v16  ;;  %v3109_v12 = vor.u32 %v3738_v6, %v3108_v5  ;;  %v3237_v16 = vor.u32 %v3770_v9, %v3236_v8  ;;  %v3826_v62 = vld [vmem:[%s5777_s4 + $0x734] sm:$0xf0]  ;;  %v2646_v5 = vld [vmem:[%s5777_s4 + $0xd8] sm:$0xf0]  ;;  %v3652_v6 = vld [vmem:[%s5777_s4 + $0x1cc] sm:$0xf] }
  0xfa   :  { %v3316_v9 = vld [vmem:[%s5777_s4 + $0x608] sm:$0xf]  ;;  %v2649_v15 = vor.u32 %v3620_v2, %v2646_v5  ;;  %v2870_v2 = vld [vmem:[%s5777_s4 + $0x298] sm:$0xf0] }
  0xfb   :  { %2155 = vmatpush.bf16.msra.mxu2 %v2821_v21  ;;  %v3220_v21 = vld [vmem:[%s5777_s4 + $0x548] sm:$0xf]  ;;  %v2998_v5 = vld [vmem:[%s5777_s4 + $0x398] sm:$0xf0] }
  0xfc   :  { %2168 = vmatpush.bf16.msra.mxu3 %v2949_v26  ;;  %2131 = vmatmul.bf16.vlgmr.msra.gmra.mxu0 %v4552_v50  ;;  %v3802_v26 = vld [vmem:[%s5777_s4 + $0x674] sm:$0xf0]  ;;  %v3221_v31 = vor.u32 %v3766_v22, %v3220_v21  ;;  %v3616_v21 = vld [vmem:[%s5777_s4 + $0xac] sm:$0xf]  ;;  %v2630_v22 = vld [vmem:[%s5777_s4 + $0xb8] sm:$0xf0] }
  0xfd   :  { %2175 = vmatpush.bf16.msrb.mxu0 %v3173_v17  ;;  %2188 = vmatpush.bf16.msrb.mxu1 %v3301_v19  ;;  %v3092_v17 = vld [vmem:[%s5777_s4 + $0x448] sm:$0xf]  ;;  %v3381_v19 = vor.u32 %v3806_v11, %v3380_v10  ;;  %v3822_v11 = vld [vmem:[%s5777_s4 + $0x714] sm:$0xf0]  ;;  %v2633_v33 = vor.u32 %v3616_v21, %v2630_v22  ;;  %v3600_v22 = vld [vmem:[%s5777_s4 + $0x2c] sm:$0xf] }
  0xfe   :  { %2144 = vmatmul.bf16.vlgmr.msra.gmra.mxu1 %v4561_v55  ;;  %v3093_v27 = vor.u32 %v3734_v18, %v3092_v17  ;;  %v3444_v10 = vld [vmem:[%s5777_s4 + $0x708] sm:$0xf]  ;;  %v3046_v17 = vld [vmem:[%s5777_s4 + $0x3f8] sm:$0xf0] }
  0xff   :  { %2156 = vmatpush.bf16.msra.mxu2 %v2805_v39  ;;  %v3348_v39 = vld [vmem:[%s5777_s4 + $0x648] sm:$0xf] }
 0x100   :  { %2169 = vmatpush.bf16.msra.mxu3 %v2933_v42  ;;  %v3476_v42 = vld [vmem:[%s5777_s4 + $0x748] sm:$0xf] }
 0x101   :  { %2176 = vmatpush.bf16.msrb.mxu0 %v3157_v34  ;;  %2189 = vmatpush.bf16.msrb.mxu1 %v3285_v38  ;;  %v3365_v34 = vor.u32 %v3802_v26, %v3364_v24  ;;  %v3493_v38 = vor.u32 %v3834_v29, %v3492_v28  ;;  %v3445_v24 = vor.u32 %v3822_v11, %v3444_v10  ;;  %v2758_v28 = vld [vmem:[%s5777_s4 + $0x1b8] sm:$0xf0] }
 0x102   :  { %2157 = vmatmul.bf16.vlgmr.msra.gmra.mxu2 %v4596_v14  ;;  %v2710_v10 = vld [vmem:[%s5777_s4 + $0x158] sm:$0xf0] }
 0x103   :  { %2201 = vmatpush.bf16.msrb.mxu2 %v3429_v43  ;;  %2170 = vmatmul.bf16.vlgmr.msra.gmra.mxu3 %v4607_v20  ;;  %v3830_v43 = vld [vmem:[%s5777_s4 + $0x754] sm:$0xf0] }
 0x104   :  { %2214 = vmatpush.bf16.msrb.mxu3 %v3557_v46  ;;  %v3726_v46 = vld [vmem:[%s5777_s4 + $0x414] sm:$0xf0]  ;;  %v3477_v54 = vor.u32 %v3830_v43, %v3476_v42  ;;  %v3644_v42 = vld [vmem:[%s5777_s4 + $0x18c] sm:$0xf]  ;;  %v2742_v43 = vld [vmem:[%s5777_s4 + $0x198] sm:$0xf0] }
 0x105   :  { %2177 = vmatpush.bf16.msrb.mxu0 %v3141_v49  ;;  %2190 = vmatpush.bf16.msrb.mxu1 %v3269_v53  ;;  %v3349_v49 = vor.u32 %v3798_v40, %v3348_v39  ;;  %v3656_v53 = vld [vmem:[%s5777_s4 + $0x1ec] sm:$0xf]  ;;  %v3061_v61 = vor.u32 %v3726_v46, %v3060_v44  ;;  %v2614_v40 = vld [vmem:[%s5777_s4 + $0x98] sm:$0xf0] }
 0x106   :  { %v2793_v3 = vor.u32 %v3656_v53, %v2790_v56  ;;  %v3612_v39 = vld [vmem:[%s5777_s4 + $0x8c] sm:$0xf]  ;;  %v3014_v53 = vld [vmem:[%s5777_s4 + $0x3b8] sm:$0xf0] }
 0x107   :  { %2202 = vmatpush.bf16.msrb.mxu2 %v3413_v59  ;;  %v3332_v59 = vld [vmem:[%s5777_s4 + $0x628] sm:$0xf]  ;;  %v3680_v46 = vld [vmem:[%s5777_s4 + $0x2ac] sm:$0xf] }
 0x108   :  { %2215 = vmatpush.bf16.msrb.mxu3 %v3541_v35  ;;  %v3460_v35 = vld [vmem:[%s5777_s4 + $0x728] sm:$0xf]  ;;  %v3608_v56 = vld [vmem:[%s5777_s4 + $0x6c] sm:$0xf] }
 0x109   :  { %2178 = vmatpush.bf16.msrb.mxu0 %v3125_v1  ;;  %2191 = vmatpush.bf16.msrb.mxu1 %v3253_v4  ;;  %v2665_v1 = vor.u32 %v3624_v51, %v2662_v52  ;;  %v3333_v4 = vor.u32 %v3794_v60, %v3332_v59  ;;  %v3461_v8 = vor.u32 %v3826_v62, %v3460_v35  ;;  %v3712_v52 = vld [vmem:[%s5777_s4 + $0x3ac] sm:$0xf]  ;;  %v2598_v59 = vld [vmem:[%s5777_s4 + $0x78] sm:$0xf0] }
 0x10a   :  { %v2617_v51 = vor.u32 %v3612_v39, %v2614_v40  ;;  %v3640_v35 = vld [vmem:[%s5777_s4 + $0x16c] sm:$0xf]  ;;  %v2726_v62 = vld [vmem:[%s5777_s4 + $0x178] sm:$0xf0] }
 0x10b   :  { %2203 = vmatpush.bf16.msrb.mxu2 %v3397_v7  ;;  %v2774_v7 = vld [vmem:[%s5777_s4 + $0x1d8] sm:$0xf0] }
 0x10c   :  { %2216 = vmatpush.bf16.msrb.mxu3 %v3525_v58  ;;  %v3790_v58 = vld [vmem:[%s5777_s4 + $0x614] sm:$0xf0]  ;;  %v2777_v18 = vor.u32 %v3652_v6, %v2774_v7  ;;  %v2729_v6 = vor.u32 %v3640_v35, %v2726_v62  ;;  %v3604_v7 = vld [vmem:[%s5777_s4 + $0x4c] sm:$0xf]  ;;  %v2950_v35 = vld [vmem:[%s5777_s4 + $0x338] sm:$0xf0] }
 0x10d   :  { %2179 = vmatpush.bf16.msrb.mxu0 %v3109_v12  ;;  %2192 = vmatpush.bf16.msrb.mxu1 %v3237_v16  ;;  %v3688_v12 = vld [vmem:[%s5777_s4 + $0x2ec] sm:$0xf] }
 0x10e   :  { %v3720_v16 = vld [vmem:[%s5777_s4 + $0x3ec] sm:$0xf]  ;;  %v2921_v26 = vor.u32 %v3688_v12, %v2918_v13 }
 0x10f   :  { %2204 = vmatpush.bf16.msrb.mxu2 %v3381_v19  ;;  %v3317_v19 = vor.u32 %v3790_v58, %v3316_v9  ;;  %v3049_v29 = vor.u32 %v3720_v16, %v3046_v17  ;;  %v3636_v58 = vld [vmem:[%s5777_s4 + $0x14c] sm:$0xf] }
 0x110   :  { %2217 = vmatpush.bf16.msrb.mxu3 %v3509_v23  ;;  %v5394_v23 = vld [vmem:[%s5778_s5] sm:$0xf]  ;;  %v3672_v13 = vld [vmem:[%s5777_s4 + $0x26c] sm:$0xf]  ;;  %v2713_v21 = vor.u32 %v3636_v58, %v2710_v10  ;;  %v2806_v10 = vld [vmem:[%s5777_s4 + $0x218] sm:$0xf0] }
 0x111   :  { %2180 = vmatpush.bf16.msrb.mxu0 %v3093_v27  ;;  %2193 = vmatpush.bf16.msrb.mxu1 %v3221_v31  ;;  %v3648_v27 = vld [vmem:[%s5777_s4 + $0x1ac] sm:$0xf] }
 0x112   :  { %v3684_v31 = vld [vmem:[%s5777_s4 + $0x2cc] sm:$0xf] }
 0x113   :  { %2205 = vmatpush.bf16.msrb.mxu2 %v3365_v34  ;;  %v627_v34 = vperm.slane %v5394_v23, 0  ;;  %v3660_v58 = vld [vmem:[%s5777_s4 + $0x20c] sm:$0xf] }
 0x114   :  { %2218 = vmatpush.bf16.msrb.mxu3 %v3493_v38  ;;  %v2761_v38 = vor.u32 %v3648_v27, %v2758_v28  ;;  %v3632_v27 = vld [vmem:[%s5777_s4 + $0x12c] sm:$0xf]  ;;  %v2694_v28 = vld [vmem:[%s5777_s4 + $0x138] sm:$0xf0] }
 0x115   :  { %2181 = vmatpush.bf16.msrb.mxu0 %v3077_v41  ;;  %2194 = vmatpush.bf16.msrb.mxu1 %v3205_v45  ;;  %v2905_v41 = vor.u32 %v3684_v31, %v2902_v32  ;;  %v3033_v45 = vor.u32 %v3716_v36, %v3030_v37  ;;  %v3668_v31 = vld [vmem:[%s5777_s4 + $0x24c] sm:$0xf]  ;;  %v2838_v32 = vld [vmem:[%s5777_s4 + $0x258] sm:$0xf0] }
 0x116   :  { %v3700_v36 = vld [vmem:[%s5777_s4 + $0x34c] sm:$0xf]  ;;  %v2966_v37 = vld [vmem:[%s5777_s4 + $0x358] sm:$0xf0] }
 0x117   :  { %2206 = vmatpush.bf16.msrb.mxu2 %v3349_v49  ;;  %v1924_v44 = vpop.f32.mrf.mxu0  ;;  %v1937_v49 = vpop.f32.mrf.mxu1 }
 0x118   :  { %2219 = vmatpush.bf16.msrb.mxu3 %v3477_v54  ;;  %v1925_v48 = vadd.f32 %v1924_v44, %v627_v34  ;;  %v2745_v54 = vor.u32 %v3644_v42, %v2742_v43  ;;  %v2550_v42 = vld [vmem:[%s5777_s4 + $0x18] sm:$0xf0]  ;;  %v3628_v43 = vld [vmem:[%s5777_s4 + $0x10c] sm:$0xf] }
 0x119   :  { %2182 = vmatpush.bf16.msrb.mxu0 %v3061_v61  ;;  %2195 = vmatpush.bf16.msrb.mxu1 %v3189_v0  ;;  %v2889_v61 = vor.u32 %v3680_v46, %v2886_v47  ;;  %v3017_v0 = vor.u32 %v3712_v52, %v3014_v53  ;;  %v2678_v44 = vld [vmem:[%s5777_s4 + $0x118] sm:$0xf0]  ;;  %v3752_v46 = vld [vmem:[%s5777_s4 + $0x4ec] sm:$0xf]  ;;  %v2969_v52 = vor.u32 %v3700_v36, %v2966_v37 }
 0x11a   :  { %v1938_v60 = vadd.f32 %v1937_v49, %v1925_v48  ;;  %v3174_v47 = vld [vmem:[%s5777_s4 + $0x4f8] sm:$0xf0]  ;;  %v3784_v48 = vld [vmem:[%s5777_s4 + $0x5ec] sm:$0xf] }
 0x11b   :  { %2207 = vmatpush.bf16.msrb.mxu2 %v3333_v4  ;;  %v3708_v4 = vld [vmem:[%s5777_s4 + $0x38c] sm:$0xf]  ;;  %v3302_v53 = vld [vmem:[%s5777_s4 + $0x5f8] sm:$0xf0] }
 0x11c   :  { %2220 = vmatpush.bf16.msrb.mxu3 %v3461_v8  ;;  %2183 = vmatmul.bf16.vlgmr.msrb.gmra.mxu0 %v4659_v57  ;;  %v2582_v8 = vld [vmem:[%s5777_s4 + $0x58] sm:$0xf0]  ;;  %v3001_v12 = vor.u32 %v3708_v4, %v2998_v5  ;;  %v3812_v37 = vld [vmem:[%s5777_s4 + $0x6cc] sm:$0xf] }
 0x11d   :  { %2227 = vmatpush.bf16.msra.mxu0 %v2665_v1  ;;  %2240 = vmatpush.bf16.msra.mxu1 %v2793_v3  ;;  %v3676_v1 = vld [vmem:[%s5777_s4 + $0x28c] sm:$0xf]  ;;  %v2601_v3 = vor.u32 %v3608_v56, %v2598_v59  ;;  %v2585_v17 = vor.u32 %v3604_v7, %v2582_v8  ;;  %v2822_v56 = vld [vmem:[%s5777_s4 + $0x238] sm:$0xf0] }
 0x11e   :  { %2196 = vmatmul.bf16.vlgmr.msrb.gmra.mxu1 %v4670_v63  ;;  %v2873_v9 = vor.u32 %v3676_v1, %v2870_v2  ;;  %v3177_v1 = vor.u32 %v3752_v46, %v3174_v47  ;;  %v3748_v2 = vld [vmem:[%s5777_s4 + $0x4cc] sm:$0xf]  ;;  %v3158_v5 = vld [vmem:[%s5777_s4 + $0x4d8] sm:$0xf0] }
 0x11f   :  { %2208 = vmatpush.bf16.msrb.mxu2 %v3317_v19  ;;  %v1926_v11 = vpop.f32.mrf.mxu0  ;;  %v1939_v16 = vpop.f32.mrf.mxu1  ;;  %v2982_v19 = vld [vmem:[%s5777_s4 + $0x378] sm:$0xf0] }
 0x120   :  { %2221 = vmatpush.bf16.msrb.mxu3 %v3445_v24  ;;  %v2566_v24 = vld [vmem:[%s5777_s4 + $0x38] sm:$0xf0]  ;;  %v3692_v11 = vld [vmem:[%s5777_s4 + $0x30c] sm:$0xf] }
 0x121   :  { %2228 = vmatpush.bf16.msra.mxu0 %v2649_v15  ;;  %2241 = vmatpush.bf16.msra.mxu1 %v2777_v18  ;;  %v2854_v15 = vld [vmem:[%s5777_s4 + $0x278] sm:$0xf0]  ;;  %v3704_v18 = vld [vmem:[%s5777_s4 + $0x36c] sm:$0xf]  ;;  %v2569_v34 = vor.u32 %v3600_v22, %v2566_v24  ;;  %v2809_v24 = vor.u32 %v3660_v58, %v2806_v10 }
 0x122   :  { %2209 = vmatmul.bf16.vlgmr.msrb.gmra.mxu2 %v4707_v25  ;;  %v3286_v7 = vld [vmem:[%s5777_s4 + $0x5d8] sm:$0xf0]  ;;  %v3732_v10 = vld [vmem:[%s5777_s4 + $0x44c] sm:$0xf] }
 0x123   :  { %2253 = vmatpush.bf16.msra.mxu2 %v2921_v26  ;;  %2222 = vmatmul.bf16.vlgmr.msrb.gmra.mxu3 %v4718_v30  ;;  %v2857_v26 = vor.u32 %v3672_v13, %v2854_v15  ;;  %v2934_v13 = vld [vmem:[%s5777_s4 + $0x318] sm:$0xf0]  ;;  %v3816_v15 = vld [vmem:[%s5777_s4 + $0x6ec] sm:$0xf] }
 0x124   :  { %2266 = vmatpush.bf16.msra.mxu3 %v3049_v29  ;;  %v2985_v29 = vor.u32 %v3704_v18, %v2982_v19  ;;  %v3430_v16 = vld [vmem:[%s5777_s4 + $0x6f8] sm:$0xf0]  ;;  %v3161_v18 = vor.u32 %v3748_v2, %v3158_v5  ;;  %v3848_v19 = vld [vmem:[%s5777_s4 + $0x7ec] sm:$0xf] }
 0x125   :  { %2229 = vmatpush.bf16.msra.mxu0 %v2633_v33  ;;  %2242 = vmatpush.bf16.msra.mxu1 %v2761_v38  ;;  %v1950_v33 = vpop.f32.mrf.mxu2  ;;  %v3596_v38 = vld [vmem:[%s5777_s4 + $0xc] sm:$0xf]  ;;  %v1963_v40 = vpop.f32.mrf.mxu3 }
 0x126   :  { %v1951_v39 = vadd.f32 %v1950_v33, %v1938_v60  ;;  %v2553_v60 = vor.u32 %v3596_v38, %v2550_v42  ;;  %v3270_v33 = vld [vmem:[%s5777_s4 + $0x5b8] sm:$0xf0] }
 0x127   :  { %2254 = vmatpush.bf16.msra.mxu2 %v2905_v41  ;;  %v2697_v41 = vor.u32 %v3632_v27, %v2694_v28  ;;  %v3142_v27 = vld [vmem:[%s5777_s4 + $0x4b8] sm:$0xf0] }
 0x128   :  { %2267 = vmatpush.bf16.msra.mxu3 %v3033_v45  ;;  %v2841_v45 = vor.u32 %v3668_v31, %v2838_v32  ;;  %v1964_v49 = vadd.f32 %v1963_v40, %v1951_v39  ;;  %v3433_v31 = vor.u32 %v3816_v15, %v3430_v16  ;;  %v3776_v32 = vld [vmem:[%s5777_s4 + $0x5ac] sm:$0xf]  ;;  %v3126_v42 = vld [vmem:[%s5777_s4 + $0x498] sm:$0xf0] }
 0x129   :  { %2230 = vmatpush.bf16.msra.mxu0 %v2617_v51  ;;  %2243 = vmatpush.bf16.msra.mxu1 %v2745_v54  ;;  %v1976_v51 = vpop.f32.mrf.mxu0  ;;  %v3664_v54 = vld [vmem:[%s5777_s4 + $0x22c] sm:$0xf]  ;;  %v1989_v59 = vpop.f32.mrf.mxu1  ;;  %v3273_v40 = vor.u32 %v3776_v32, %v3270_v33  ;;  %v3222_v16 = vld [vmem:[%s5777_s4 + $0x558] sm:$0xf0] }
 0x12a   :  { %v1977_v62 = vadd.f32 %v1976_v51, %v1964_v49  ;;  %v2825_v4 = vor.u32 %v3664_v54, %v2822_v56  ;;  %v3844_v39 = vld [vmem:[%s5777_s4 + $0x7cc] sm:$0xf]  ;;  %v3398_v49 = vld [vmem:[%s5777_s4 + $0x6b8] sm:$0xf0] }
 0x12b   :  { %2255 = vmatpush.bf16.msra.mxu2 %v2889_v61  ;;  %v3696_v61 = vld [vmem:[%s5777_s4 + $0x32c] sm:$0xf] }
 0x12c   :  { %2268 = vmatpush.bf16.msra.mxu3 %v3017_v0  ;;  %v2681_v0 = vor.u32 %v3628_v43, %v2678_v44  ;;  %v1990_v8 = vadd.f32 %v1989_v59, %v1977_v62  ;;  %v3772_v44 = vld [vmem:[%s5777_s4 + $0x58c] sm:$0xf]  ;;  %v3526_v59 = vld [vmem:[%s5777_s4 + $0x7b8] sm:$0xf0] }
 0x12d   :  { %2231 = vmatpush.bf16.msra.mxu0 %v2601_v3  ;;  %2244 = vmatpush.bf16.msra.mxu1 %v2729_v6  ;;  %v3305_v3 = vor.u32 %v3784_v48, %v3302_v53  ;;  %v3780_v6 = vld [vmem:[%s5777_s4 + $0x5cc] sm:$0xf]  ;;  %v628_v53 = vperm.slane %v5394_v23, 1 }
 0x12e   :  { %v3289_v22 = vor.u32 %v3780_v6, %v3286_v7  ;;  %v3808_v48 = vld [vmem:[%s5777_s4 + $0x6ac] sm:$0xf] }
 0x12f   :  { %2256 = vmatpush.bf16.msra.mxu2 %v2873_v9  ;;  %v2953_v9 = vor.u32 %v3696_v61, %v2950_v35  ;;  %v3840_v56 = vld [vmem:[%s5777_s4 + $0x7ac] sm:$0xf]  ;;  %v3110_v61 = vld [vmem:[%s5777_s4 + $0x478] sm:$0xf0]  ;;  %v3401_v62 = vor.u32 %v3808_v48, %v3398_v49 }
 0x130   :  { %2269 = vmatpush.bf16.msra.mxu3 %v3001_v12  ;;  %v1952_v12 = vpop.f32.mrf.mxu2  ;;  %v3529_v2 = vor.u32 %v3840_v56, %v3526_v59  ;;  %v3764_v15 = vld [vmem:[%s5777_s4 + $0x54c] sm:$0xf]  ;;  %v3462_v59 = vld [vmem:[%s5777_s4 + $0x738] sm:$0xf0] }
 0x131   :  { %2232 = vmatpush.bf16.msra.mxu0 %v2585_v17  ;;  %2245 = vmatpush.bf16.msra.mxu1 %v2713_v21  ;;  %v1965_v17 = vpop.f32.mrf.mxu3  ;;  %v3558_v21 = vld [vmem:[%s5777_s4 + $0x7f8] sm:$0xf0]  ;;  %v1978_v28 = vpop.f32.mrf.mxu0  ;;  %v3760_v33 = vld [vmem:[%s5777_s4 + $0x52c] sm:$0xf] }
 0x132   :  { %v3561_v36 = vor.u32 %v3848_v19, %v3558_v21  ;;  %v3800_v19 = vld [vmem:[%s5777_s4 + $0x66c] sm:$0xf]  ;;  %v3366_v21 = vld [vmem:[%s5777_s4 + $0x678] sm:$0xf0]  ;;  %v3225_v28 = vor.u32 %v3764_v15, %v3222_v16 }
 0x133   :  { %2257 = vmatpush.bf16.msra.mxu2 %v2857_v26  ;;  %v3744_v26 = vld [vmem:[%s5777_s4 + $0x4ac] sm:$0xf]  ;;  %v3369_v32 = vor.u32 %v3800_v19, %v3366_v21 }
 0x134   :  { %2270 = vmatpush.bf16.msra.mxu3 %v2985_v29  ;;  %v2937_v29 = vor.u32 %v3692_v11, %v2934_v13  ;;  %v3145_v38 = vor.u32 %v3744_v26, %v3142_v27  ;;  %v3094_v11 = vld [vmem:[%s5777_s4 + $0x458] sm:$0xf0]  ;;  %v3832_v26 = vld [vmem:[%s5777_s4 + $0x76c] sm:$0xf] }
 0x135   :  { %2233 = vmatpush.bf16.msra.mxu0 %v2569_v34  ;;  %2246 = vmatpush.bf16.msra.mxu1 %v2697_v41  ;;  %v1991_v34 = vpop.f32.mrf.mxu1  ;;  %v3740_v41 = vld [vmem:[%s5777_s4 + $0x48c] sm:$0xf]  ;;  %v3494_v27 = vld [vmem:[%s5777_s4 + $0x778] sm:$0xf0] }
 0x136   :  { %v3129_v54 = vor.u32 %v3740_v41, %v3126_v42  ;;  %v3206_v34 = vld [vmem:[%s5777_s4 + $0x538] sm:$0xf0]  ;;  %v3792_v49 = vld [vmem:[%s5777_s4 + $0x62c] sm:$0xf] }
 0x137   :  { %2258 = vmatpush.bf16.msra.mxu2 %v2841_v45  ;;  %v3254_v45 = vld [vmem:[%s5777_s4 + $0x598] sm:$0xf0]  ;;  %v3209_v42 = vor.u32 %v3760_v33, %v3206_v34  ;;  %v3824_v56 = vld [vmem:[%s5777_s4 + $0x72c] sm:$0xf] }
 0x138   :  { %2271 = vmatpush.bf16.msra.mxu3 %v2969_v52  ;;  %v2002_v46 = vpop.f32.mrf.mxu2  ;;  %v3478_v41 = vld [vmem:[%s5777_s4 + $0x758] sm:$0xf0] }
 0x139   :  { %2234 = vmatpush.bf16.msra.mxu0 %v2553_v60  ;;  %2247 = vmatpush.bf16.msra.mxu1 %v2681_v0  ;;  %v2003_v51 = vadd.f32 %v2002_v46, %v1990_v8  ;;  %v2015_v52 = vpop.f32.mrf.mxu3  ;;  %v3257_v60 = vor.u32 %v3772_v44, %v3254_v45  ;;  %v3768_v0 = vld [vmem:[%s5777_s4 + $0x56c] sm:$0xf]  ;;  %v3062_v44 = vld [vmem:[%s5777_s4 + $0x418] sm:$0xf0] }
 0x13a   :  { %v3836_v8 = vld [vmem:[%s5777_s4 + $0x78c] sm:$0xf] }
 0x13b   :  { %2259 = vmatpush.bf16.msra.mxu2 %v2825_v4  ;;  %v5646_v35 = vadd.f32 %v2015_v52, %v2003_v51  ;;  %v3382_v4 = vld [vmem:[%s5777_s4 + $0x698] sm:$0xf0]  ;;  %v3756_v46 = vld [vmem:[%s5777_s4 + $0x50c] sm:$0xf] }
 0x13c   :  { %2272 = vmatpush.bf16.msra.mxu3 %v2953_v9  ;;  %2235 = vmatmul.bf16.vlgmr.msra.gmra.mxu0 %v4552_v50  ;;  %v3414_v50 = vld [vmem:[%s5777_s4 + $0x6d8] sm:$0xf0] }
 0x13d   :  { %2279 = vmatpush.bf16.msrb.mxu0 %v3177_v1  ;;  %2292 = vmatpush.bf16.msrb.mxu1 %v3305_v3  ;;  %v3417_v43 = vor.u32 %v3812_v37, %v3414_v50  ;;  %v2028_v1 = vpop.f32.mrf.mxu0  ;;  %v3804_v3 = vld [vmem:[%s5777_s4 + $0x68c] sm:$0xf]  ;;  %v2041_v6 = vpop.f32.mrf.mxu1  ;;  %v3510_v9 = vld [vmem:[%s5777_s4 + $0x798] sm:$0xf0]  ;;  %v3497_v37 = vor.u32 %v3832_v26, %v3494_v27  ;;  %v2331_v16 = vmax.f32 %v5646_v35, 0.0  ;;  %v629_v27 = vperm.slane %v5394_v23, 2 }
 0x13e   :  { %2248 = vmatmul.bf16.vlgmr.msra.gmra.mxu1 %v4561_v55  ;;  %v3542_v55 = vld [vmem:[%s5777_s4 + $0x7d8] sm:$0xf0]  ;;  %v2029_v5 = vadd.f32 %v2028_v1, %v628_v53  ;;  %v3385_v13 = vor.u32 %v3804_v3, %v3382_v4  ;;  %v3796_v50 = vld [vmem:[%s5777_s4 + $0x64c] sm:$0xf] }
 0x13f   :  { %2260 = vmatpush.bf16.msra.mxu2 %v2809_v24  ;;  %v3545_v47 = vor.u32 %v3844_v39, %v3542_v55  ;;  %v3097_v24 = vor.u32 %v3732_v10, %v3094_v11  ;;  %v3334_v51 = vld [vmem:[%s5777_s4 + $0x638] sm:$0xf0] }
 0x140   :  { %2273 = vmatpush.bf16.msra.mxu3 %v2937_v29  ;;  %v2042_v12 = vadd.f32 %v2041_v6, %v2029_v5  ;;  %v2004_v17 = vpop.f32.mrf.mxu2  ;;  %v3728_v29 = vld [vmem:[%s5777_s4 + $0x42c] sm:$0xf]  ;;  %v3318_v1 = vld [vmem:[%s5777_s4 + $0x618] sm:$0xf0] }
 0x141   :  { %2280 = vmatpush.bf16.msrb.mxu0 %v3161_v18  ;;  %2293 = vmatpush.bf16.msrb.mxu1 %v3289_v22  ;;  %v3513_v18 = vor.u32 %v3836_v8, %v3510_v9  ;;  %v2017_v22 = vpop.f32.mrf.mxu3  ;;  %v3446_v3 = vld [vmem:[%s5777_s4 + $0x718] sm:$0xf0] }
 0x142   :  { %2261 = vmatmul.bf16.vlgmr.msra.gmra.mxu2 %v4596_v14  ;;  %v3736_v14 = vld [vmem:[%s5777_s4 + $0x46c] sm:$0xf] }
 0x143   :  { %2305 = vmatpush.bf16.msrb.mxu2 %v3433_v31  ;;  %2274 = vmatmul.bf16.vlgmr.msra.gmra.mxu3 %v4607_v20  ;;  %v3238_v20 = vld [vmem:[%s5777_s4 + $0x578] sm:$0xf0]  ;;  %v3113_v7 = vor.u32 %v3736_v14, %v3110_v61  ;;  %v3337_v61 = vor.u32 %v3792_v49, %v3334_v51 }
 0x144   :  { %2318 = vmatpush.bf16.msrb.mxu3 %v3561_v36  ;;  %v3241_v58 = vor.u32 %v3768_v0, %v3238_v20  ;;  %v3078_v31 = vld [vmem:[%s5777_s4 + $0x438] sm:$0xf0]  ;;  %v3465_v0 = vor.u32 %v3824_v56, %v3462_v59  ;;  %v3788_v20 = vld [vmem:[%s5777_s4 + $0x60c] sm:$0xf] }
 0x145   :  { %2281 = vmatpush.bf16.msrb.mxu0 %v3145_v38  ;;  %2294 = vmatpush.bf16.msrb.mxu1 %v3273_v40  ;;  %v2030_v36 = vpop.f32.mrf.mxu0  ;;  %v3350_v38 = vld [vmem:[%s5777_s4 + $0x658] sm:$0xf0]  ;;  %v2043_v39 = vpop.f32.mrf.mxu1  ;;  %v3081_v55 = vor.u32 %v3728_v29, %v3078_v31  ;;  %v3828_v40 = vld [vmem:[%s5777_s4 + $0x74c] sm:$0xf]  ;;  %v3321_v4 = vor.u32 %v3788_v20, %v3318_v1  ;;  %v630_v20 = vperm.slane %v5394_v23, 3 }
 0x146   :  { %v3353_v45 = vor.u32 %v3796_v50, %v3350_v38  ;;  %v3481_v48 = vor.u32 %v3828_v40, %v3478_v41 }
 0x147   :  { %2306 = vmatpush.bf16.msrb.mxu2 %v3417_v43  ;;  %v3724_v43 = vld [vmem:[%s5777_s4 + $0x40c] sm:$0xf] }
 0x148   :  { %2319 = vmatpush.bf16.msrb.mxu3 %v3545_v47  ;;  %v3190_v47 = vld [vmem:[%s5777_s4 + $0x518] sm:$0xf0]  ;;  %v2054_v52 = vpop.f32.mrf.mxu2 }
 0x149   :  { %2282 = vmatpush.bf16.msrb.mxu0 %v3129_v54  ;;  %2295 = vmatpush.bf16.msrb.mxu1 %v3257_v60  ;;  %v2067_v53 = vpop.f32.mrf.mxu3  ;;  %v3065_v54 = vor.u32 %v3724_v43, %v3062_v44  ;;  %v2055_v60 = vadd.f32 %v2054_v52, %v2042_v12  ;;  %v3193_v14 = vor.u32 %v3756_v46, %v3190_v47 }
 0x14b   :  { %2307 = vmatpush.bf16.msrb.mxu2 %v3401_v62  ;;  %v2068_v62 = vadd.f32 %v2067_v53, %v2055_v60 }
 0x14c   :  { %2320 = vmatpush.bf16.msrb.mxu3 %v3529_v2  ;;  %v3820_v2 = vld [vmem:[%s5777_s4 + $0x70c] sm:$0xf] }
 0x14d   :  { %2283 = vmatpush.bf16.msrb.mxu0 %v3113_v7  ;;  %2296 = vmatpush.bf16.msrb.mxu1 %v3241_v58  ;;  %v3449_v5 = vor.u32 %v3820_v2, %v3446_v3 }
 0x14f   :  { %2308 = vmatpush.bf16.msrb.mxu2 %v3385_v13 }
 0x150   :  { %2321 = vmatpush.bf16.msrb.mxu3 %v3513_v18  ;;  %v2056_v6 = vpop.f32.mrf.mxu2 }
 0x151   :  { %2284 = vmatpush.bf16.msrb.mxu0 %v3097_v24  ;;  %2297 = vmatpush.bf16.msrb.mxu1 %v3225_v28  ;;  %v2069_v7 = vpop.f32.mrf.mxu3 }
 0x153   :  { %2309 = vmatpush.bf16.msrb.mxu2 %v3369_v32 }
 0x154   :  { %2322 = vmatpush.bf16.msrb.mxu3 %v3497_v37 }
 0x155   :  { %2285 = vmatpush.bf16.msrb.mxu0 %v3081_v55  ;;  %2298 = vmatpush.bf16.msrb.mxu1 %v3209_v42 }
 0x157   :  { %2310 = vmatpush.bf16.msrb.mxu2 %v3353_v45 }
 0x158   :  { %2323 = vmatpush.bf16.msrb.mxu3 %v3481_v48 }
 0x159   :  { %2286 = vmatpush.bf16.msrb.mxu0 %v3065_v54  ;;  %2299 = vmatpush.bf16.msrb.mxu1 %v3193_v14  ;;  %v2080_v8 = vpop.f32.mrf.mxu0 }
 0x15a   :  { %v2081_v9 = vadd.f32 %v2080_v8, %v2068_v62 }
 0x15b   :  { %2311 = vmatpush.bf16.msrb.mxu2 %v3337_v61  ;;  %v2093_v58 = vpop.f32.mrf.mxu1 }
 0x15c   :  { %2324 = vmatpush.bf16.msrb.mxu3 %v3465_v0  ;;  %2287 = vmatmul.bf16.vlgmr.msrb.gmra.mxu0 %v4659_v57  ;;  %v2094_v10 = vadd.f32 %v2093_v58, %v2081_v9  ;;  %v5757_v57 = vld [vmem:[%s5779_s6] sm:$0xf] }
 0x15d   :  { %2300 = vmatmul.bf16.vlgmr.msrb.gmra.mxu1 %v4670_v63  ;;  %v2339_v49 = vperm.slane %v5757_v57, 2 }
 0x15f   :  { %2312 = vmatpush.bf16.msrb.mxu2 %v3321_v4 }
 0x160   :  { %2325 = vmatpush.bf16.msrb.mxu3 %v3449_v5 }
 0x161   :  { %v2082_v11 = vpop.f32.mrf.mxu0 }
 0x162   :  { %2313 = vmatmul.bf16.vlgmr.msrb.gmra.mxu2 %v4707_v25  ;;  %v2337_v25 = vperm.slane %v5757_v57, 0 }
 0x163   :  { %2326 = vmatmul.bf16.vlgmr.msrb.gmra.mxu3 %v4718_v30  ;;  %v2095_v12 = vpop.f32.mrf.mxu1  ;;  %v2338_v30 = vperm.slane %v5757_v57, 1 }
 0x164   :  { %v2345_v19 = vmul.f32 %v2337_v25, %v2331_v16  ;;  %v2340_v16 = vperm.slane %v5757_v57, 3 }
 0x165   :  { %v2106_v63 = vpop.f32.mrf.mxu2 }
 0x166   :  { %v2107_v13 = vadd.f32 %v2106_v63, %v2094_v10  ;;  %v2119_v15 = vpop.f32.mrf.mxu3 }
 0x168   :  { %v2120_v17 = vadd.f32 %v2119_v15, %v2107_v13 }
 0x16a   :  { %v2332_v18 = vmax.f32 %v2120_v17, 0.0 }
 0x16c   :  { %v2346_v21 = vmul.f32 %v2338_v30, %v2332_v18 }
 0x16d   :  { %v2108_v22 = vpop.f32.mrf.mxu2 }
 0x16e   :  { %v2121_v24 = vpop.f32.mrf.mxu3  ;;  %v2349_v26 = vadd.f32 %v2346_v21, %v2345_v19  ;;  %v3885_v19 = vmov 0   ;;  %v3854_v21 = vld [vmem:[#allocation2] ss:$0 sm:$0xff] }
 0x16f   :  { %3853 = vset.pattern.permute.xlu0 %v3885_v19 }
 0x179   :  { %v2132_v28 = vpop.f32.mrf.mxu0 }
 0x17a   :  { %v2133_v29 = vadd.f32 %v2132_v28, %v629_v27 }
 0x17b   :  { %v2145_v31 = vpop.f32.mrf.mxu1 }
 0x17c   :  { %v2146_v32 = vadd.f32 %v2145_v31, %v2133_v29 }
 0x181   :  { %v2134_v33 = vpop.f32.mrf.mxu0 }
 0x183   :  { %v2147_v34 = vpop.f32.mrf.mxu1 }
 0x185   :  { %v2158_v35 = vpop.f32.mrf.mxu2 }
 0x186   :  { %v2159_v36 = vadd.f32 %v2158_v35, %v2146_v32  ;;  %v2171_v37 = vpop.f32.mrf.mxu3 }
 0x188   :  { %v2172_v50 = vadd.f32 %v2171_v37, %v2159_v36 }
 0x18d   :  { %v2160_v38 = vpop.f32.mrf.mxu2 }
 0x18e   :  { %v2173_v39 = vpop.f32.mrf.mxu3 }
 0x199   :  { %v2184_v55 = vpop.f32.mrf.mxu0 }
 0x19a   :  { %v2185_v40 = vadd.f32 %v2184_v55, %v2172_v50 }
 0x19b   :  { %v2197_v41 = vpop.f32.mrf.mxu1 }
 0x19c   :  { %v2198_v42 = vadd.f32 %v2197_v41, %v2185_v40 }
 0x1a1   :  { %v2186_v43 = vpop.f32.mrf.mxu0 }
 0x1a3   :  { %v2199_v44 = vpop.f32.mrf.mxu1 }
 0x1a5   :  { %v2210_v45 = vpop.f32.mrf.mxu2 }
 0x1a6   :  { %v2211_v46 = vadd.f32 %v2210_v45, %v2198_v42  ;;  %v2223_v47 = vpop.f32.mrf.mxu3 }
 0x1a8   :  { %v2224_v48 = vadd.f32 %v2223_v47, %v2211_v46 }
 0x1aa   :  { %v2333_v51 = vmax.f32 %v2224_v48, 0.0 }
 0x1ac   :  { %v2347_v52 = vmul.f32 %v2339_v49, %v2333_v51 }
 0x1ad   :  { %v2212_v53 = vpop.f32.mrf.mxu2 }
 0x1ae   :  { %v2225_v54 = vpop.f32.mrf.mxu3  ;;  %v2350_v56 = vadd.f32 %v2349_v26, %v2347_v52  ;;  %v2359_v26 = vld [vmem:[%s5773_s0] sm:$0xff]  ;;  %s2393_s0 = sshll.u32 %s5781_s8, 4  ;;  %s2394_s0 = int_to_ptr.hbm [resolvable:$true] %s2393_s0 }
 0x1b9   :  { %v2236_v59 = vpop.f32.mrf.mxu0 }
 0x1ba   :  { %v2237_v3 = vadd.f32 %v2236_v59, %v630_v20 }
 0x1bb   :  { %v2249_v60 = vpop.f32.mrf.mxu1 }
 0x1bc   :  { %v2250_v4 = vadd.f32 %v2249_v60, %v2237_v3 }
 0x1c1   :  { %v2238_v14 = vpop.f32.mrf.mxu0 }
 0x1c3   :  { %v2251_v61 = vpop.f32.mrf.mxu1 }
 0x1c5   :  { %v2262_v62 = vpop.f32.mrf.mxu2 }
 0x1c6   :  { %v2275_v0 = vpop.f32.mrf.mxu3  ;;  %v2263_v6 = vadd.f32 %v2262_v62, %v2250_v4 }
 0x1c8   :  { %v2276_v8 = vadd.f32 %v2275_v0, %v2263_v6 }
 0x1cd   :  { %v2264_v1 = vpop.f32.mrf.mxu2 }
 0x1ce   :  { %v2277_v2 = vpop.f32.mrf.mxu3 }
 0x1d9   :  { %v2288_v5 = vpop.f32.mrf.mxu0 }
 0x1da   :  { %v2301_v7 = vpop.f32.mrf.mxu1  ;;  %v2289_v9 = vadd.f32 %v2288_v5, %v2276_v8 }
 0x1dc   :  { %v2302_v11 = vadd.f32 %v2301_v7, %v2289_v9 }
 0x1e1   :  { %v2290_v58 = vpop.f32.mrf.mxu0 }
 0x1e2   :  { %v2303_v10 = vpop.f32.mrf.mxu1 }
 0x1e5   :  { %v2314_v12 = vpop.f32.mrf.mxu2 }
 0x1e6   :  { %v2315_v63 = vadd.f32 %v2314_v12, %v2302_v11  ;;  %v2327_v13 = vpop.f32.mrf.mxu3 }
 0x1e8   :  { %v2328_v15 = vadd.f32 %v2327_v13, %v2315_v63 }
 0x1ea   :  { %v2334_v25 = vmax.f32 %v2328_v15, 0.0 }
 0x1ec   :  { %v2348_v23 = vmul.f32 %v2340_v16, %v2334_v25 }
 0x1ed   :  { %v2316_v17 = vpop.f32.mrf.mxu2 }
 0x1ee   :  { %v2329_v30 = vpop.f32.mrf.mxu3  ;;  %v2351_v18 = vadd.f32 %v2350_v56, %v2348_v23 }
 0x1f0   :  { %2352 = vadd.xlane.f32.xlu0 %v2351_v18 }
 0x263   :  { %v2353_v22 = vpop.xlane.xlu0 %2352 }
 0x264   :  { %v2358_v24 = vadd.f32 %v3854_v21, %v2353_v22 }
 0x266   :  { %2362 = vperm.xlu0 %3853, %v2358_v24  }
 0x2d8   :  { %v2363_v27 = vpop.permute.xlu0 %2362 }
 0x2d9   :  { %v2365_v28 = vadd.f32 %v2363_v27, %v2359_v26 }
 0x2db   :  { %v3562_v29 = vmul.f32 -1.442695, %v2365_v28 }
 0x2dd   :  { %3855 = vpow2.f32 %v3562_v29 }
 0x2e3   :  { %v3856_v57 = vpop.eup %3855 }
 0x2e4   :  { %v2369_v31 = vadd.f32 1.0, %v3856_v57 }
 0x2e6   :  { %3857 = vrcp.f32 %v2369_v31  ;;  %v2381_v35 = vand.u32 2147483648, %v2369_v31  ;;  %v2379_v37 = vand.u32 2147483647, %v2369_v31  ;;  %vm2375_vm2 = vweird.f32 %v2369_v31 }
 0x2e8   :  { %v2382_v38 = vor.u32 1.1754944e-38, %v2381_v35  ;;  %vm2380_vm4 = vcmp.eq.f32.partialorder %v2379_v37, 8.507059e+37 }
 0x2ec   :  { %v3858_v32 = vpop.eup %3857 }
 0x2ed   :  { %v2371_v33 = vmul.f32 %v3858_v32, %v2369_v31  ;;  %vm2376_vm1 = vweird.f32 %v3858_v32 }
 0x2ee   :  { %vm2377_vm3 = vmor %vm2375_vm2, %vm2376_vm1 }
 0x2ef   :  { %v2372_v34 = vsub.f32 1.0, %v2371_v33 }
 0x2f1   :  { %v2373_v36 = vmul.f32 %v3858_v32, %v2372_v34 }
 0x2f3   :  { %v2374_v50 = vadd.f32 %v3858_v32, %v2373_v36 }
 0x2f5   :  { %v2378_v39 = vsel %vm2377_vm3, %v3858_v32, %v2374_v50 }
 0x2f6   :  { %v2383_v55 = vsel %vm2380_vm4, %v2382_v38, %v2378_v39 }
 0x2f7   :  { %2385 = vst.msk [vmem:[#allocation3] sm:$0xff] %vm245_vm0, %v2383_v55 }
 0x2f8   :  { %2396 = dma.vmem_to_hbm [thread:$0]  %s2392_s11, 128, %s2394_s0, [#allocation4]  }
 0x2f9   :  { %3883 = dma.done.wait [#allocation4], 128  }
 0x2fa   :  { %3884 = vsyncadd [#allocation4], 4294967168 }
 0x2fb   :  { %2401 = vsyncpa [#allocation4], 1 }

</bundles_post_ra>
